<compile_context>
chip_gen: v6e
topology: v6e:2x2x1
jax: 0.10.0
libtpu: 0.0.40
codegen_flags: <defaults>
</compile_context>

<pallas_src>
import functools

import jax
import jax.numpy as jnp
from jax.experimental import pallas as pl
from jax.experimental.pallas import tpu as pltpu

K = 3      # kernel size
DIL = 3    # dilation (== padding, so output spatial size == input spatial size)
EPS = 1e-5


def _conv_bn_relu_stage(xs, w_ref, gamma, beta, *, W, masks):
    """One (dilated 3x3 conv -> BatchNorm(train stats) -> ReLU) stage.

    xs:     list of N arrays, each (Cp, P) f32  (channels x flattened spatial)
    w_ref:  (K, K, Cp, Cp) VMEM ref, indexed w[ky, kx, cout, cin]
    gamma, beta: (Cp, 1) f32
    masks:  dict kx -> (1, P) bool column-validity mask (None if no mask needed)
    Returns list of N arrays, each (Cp, P) f32, post-ReLU.
    """
    Cp, P = xs[0].shape
    # Zero widening so every tap shift is a static, in-bounds lane slice.
    # Rounded up to a lane-tile multiple so the concat boundaries are aligned.
    maxsh = ((DIL * W + DIL + 127) // 128) * 128
    zpad = jnp.zeros((Cp, maxsh), jnp.float32)

    accs = []
    for x2 in xs:
        wide = jnp.concatenate([zpad, x2, zpad], axis=1)        # (Cp, P + 2*maxsh)
        acc = jnp.zeros((Cp, P), jnp.float32)
        for ky in range(K):
            dy = (ky - 1) * DIL
            for kx in range(K):
                dx = (kx - 1) * DIL
                d = dy * W + dx
                tap = jax.lax.slice_in_dim(wide, maxsh + d, maxsh + d + P, axis=1)
                m = masks[kx]
                if m is not None:            # zero columns that wrapped across a row
                    tap = jnp.where(m, tap, 0.0)
                # MXU: (Cout, Cin) x (Cin, P) -> (Cout, P), f32 accumulate.
                acc = acc + jnp.dot(w_ref[ky, kx], tap,
                                    preferred_element_type=jnp.float32)
        accs.append(acc)

    # BatchNorm2d, training-mode batch statistics, single pass (biased variance).
    cnt = jnp.float32(len(accs) * P)
    ssum = accs[0].sum(axis=1, keepdims=True)
    ssq = (accs[0] * accs[0]).sum(axis=1, keepdims=True)
    for a in accs[1:]:
        ssum = ssum + a.sum(axis=1, keepdims=True)
        ssq = ssq + (a * a).sum(axis=1, keepdims=True)
    mean = ssum / cnt
    var = jnp.maximum(ssq / cnt - mean * mean, 0.0)             # (Cp, 1)
    scale = gamma * jax.lax.rsqrt(var + EPS)
    shift = beta - mean * scale
    return [jnp.maximum(a * scale + shift, 0.0) for a in accs]  # ReLU


def _identity_block_kernel(x_ref, w1_ref, g1_ref, b1_ref, w2_ref, g2_ref, b2_ref,
                           out_ref, *, W):
    """Fused (Conv=>BN=>ReLU)*2 + residual + ReLU on (N, Cp, H*W) slabs."""
    N, Cp, P = x_ref.shape

    # Column-validity masks for the horizontal tap shifts (vertical shifts are
    # handled by the zero widening of the flattened spatial axis).
    col = jax.lax.broadcasted_iota(jnp.int32, (1, P), 1)
    ww = jax.lax.rem(col, W)
    masks = {}
    for kx in range(K):
        dx = (kx - 1) * DIL
        if dx < 0:
            masks[kx] = ww >= -dx
        elif dx > 0:
            masks[kx] = ww < (W - dx)
        else:
            masks[kx] = None

    xs = [x_ref[n] for n in range(N)]                       # each (Cp, P)
    y1 = _conv_bn_relu_stage(xs, w1_ref, g1_ref[...], b1_ref[...], W=W, masks=masks)
    y2 = _conv_bn_relu_stage(y1, w2_ref, g2_ref[...], b2_ref[...], W=W, masks=masks)
    for n in range(N):
        out_ref[n] = jnp.maximum(xs[n] + y2[n], 0.0)        # residual + final ReLU


_VMEM = pl.BlockSpec(memory_space=pltpu.MemorySpace.VMEM)


def _pad_axis(a, axis, target):
    pad = target - a.shape[axis]
    if pad == 0:
        return a
    widths = [(0, 0)] * a.ndim
    widths[axis] = (0, pad)
    return jnp.pad(a, widths)


@jax.jit
def identity_block_di_forward(x_nchw, params):
    """Forward pass.  x_nchw: (N, C, H, W) float32.

    params = (w1, b1, g1, be1, w2, b2, g2, be2); conv weights in (K, K, Cout, Cin)
    layout; conv biases b1/b2 are accepted for parity with the PyTorch module but
    are a mathematical no-op under training-mode BN, so they are not sent to the
    kernel.
    """
    w1, _b1, g1, be1, w2, _b2, g2, be2 = params
    N, C, H, W = x_nchw.shape
    P = H * W
    Cp = max(8, ((C + 7) // 8) * 8)      # pad channels to a sublane multiple

    x3 = _pad_axis(x_nchw.reshape(N, C, P).astype(jnp.float32), 1, Cp)

    def pad_w(w):
        w = _pad_axis(w.astype(jnp.float32), 2, Cp)
        return _pad_axis(w, 3, Cp)

    def pad_vec(v, fill):
        v = v.reshape(-1).astype(jnp.float32)
        v = jnp.concatenate([v, jnp.full((Cp - C,), fill, jnp.float32)])
        return v.reshape(Cp, 1)

    kernel = functools.partial(_identity_block_kernel, W=W)
    out = pl.pallas_call(
        kernel,
        out_shape=jax.ShapeDtypeStruct((N, Cp, P), jnp.float32),
        in_specs=[_VMEM] * 7,
        out_specs=_VMEM,
    )(x3, pad_w(w1), pad_vec(g1, 1.0), pad_vec(be1, 0.0),
      pad_w(w2), pad_vec(g2, 1.0), pad_vec(be2, 0.0))

    return out[:, :C, :].reshape(N, C, H, W)


# ----------------------------- pure-JAX reference -----------------------------
def _ref_forward(x, params):
    w1, b1, g1, be1, w2, b2, g2, be2 = params

    def conv(x, w, b):
        w_oikk = jnp.transpose(w, (2, 3, 0, 1))              # (K,K,O,I) -> (O,I,K,K)
        y = jax.lax.conv_general_dilated(
            x, w_oikk, window_strides=(1, 1),
            padding=((DIL, DIL), (DIL, DIL)), rhs_dilation=(DIL, DIL),
            dimension_numbers=("NCHW", "OIHW", "NCHW"))
        return y + b.reshape(1, -1, 1, 1)

    def bn_relu(y, g, be):
        mean = jnp.mean(y, axis=(0, 2, 3), keepdims=True)
        var = jnp.mean((y - mean) ** 2, axis=(0, 2, 3), keepdims=True)  # biased
        out = (y - mean) * jax.lax.rsqrt(var + EPS)
        out = out * g.reshape(1, -1, 1, 1) + be.reshape(1, -1, 1, 1)
        return jnp.maximum(out, 0.0)

    y = bn_relu(conv(x, w1, b1), g1, be1)
    y = bn_relu(conv(y, w2, b2), g2, be2)
    return jnp.maximum(x + y, 0.0)


def init_params(key, in_ch, out_ch):
    assert in_ch == out_ch, "identity block requires in_ch == out_ch for the residual"
    k1, k2 = jax.random.split(key)

    def conv_params(k):
        kw, kb = jax.random.split(k)
        # PyTorch conv weight layout (Cout, Cin, kH, kW) -> (kH, kW, Cout, Cin)
        w_torch = 0.2 * jax.random.normal(kw, (out_ch, in_ch, K, K), jnp.float32)
        w = jnp.transpose(w_torch, (2, 3, 0, 1))
        b = 0.1 * jax.random.normal(kb, (out_ch,), jnp.float32)
        return w, b

    w1, b1 = conv_params(k1)
    w2, b2 = conv_params(k2)
    c = jnp.arange(out_ch, dtype=jnp.float32)
    g1, be1 = 1.0 + 0.10 * c, 0.05 * c
    g2, be2 = 1.0 - 0.05 * c, -0.02 * c
    return (w1, b1, g1, be1, w2, b2, g2, be2)


if __name__ == "__main__":
    key = jax.random.PRNGKey(0)
    kx, kp = jax.random.split(key)
    N, C, H, W = 2, 4, 16, 16
    x = jax.random.normal(kx, (N, C, H, W), dtype=jnp.float32)
    params = init_params(kp, C, C)

    out = jax.block_until_ready(identity_block_di_forward(x, params))
    assert out.shape == (N, C, H, W)
    assert bool(jnp.all(jnp.isfinite(out)))
    assert bool(jnp.all(out >= 0.0))           # final ReLU

    ref = jax.block_until_ready(jax.jit(_ref_forward)(x, params))
    err = float(jnp.max(jnp.abs(out - ref)))
    assert err < 5e-4, f"max abs error vs reference: {err}"

    print("KERNEL_OK")
</pallas_src>

<mosaic_0001>
module attributes {stable_mosaic.version = 11 : i64} {
  func.func @_identity_block_kernel(%arg0: memref<2x8x256xf32, #tpu.memory_space<vmem>>, %arg1: memref<3x3x8x8xf32, #tpu.memory_space<vmem>>, %arg2: memref<8x1xf32, #tpu.memory_space<vmem>>, %arg3: memref<8x1xf32, #tpu.memory_space<vmem>>, %arg4: memref<3x3x8x8xf32, #tpu.memory_space<vmem>>, %arg5: memref<8x1xf32, #tpu.memory_space<vmem>>, %arg6: memref<8x1xf32, #tpu.memory_space<vmem>>, %arg7: memref<2x8x256xf32, #tpu.memory_space<vmem>>) attributes {dimension_semantics = [], scalar_prefetch = 0 : i64, scratch_operands = 0 : i64, tpu.core_type = #tpu.core_type<tc>} {
    %0 = tpu.iota {dimensions = array<i32: 1>} : vector<1x256xi32>
    %c16_i32 = arith.constant 16 : i32
    %1 = vector.broadcast %c16_i32 : i32 to vector<1x256xi32>
    %2 = arith.remsi %0, %1 : vector<1x256xi32>
    %c3_i32 = arith.constant 3 : i32
    %3 = vector.broadcast %c3_i32 : i32 to vector<1x256xi32>
    %4 = arith.cmpi sge, %2, %3 : vector<1x256xi32>
    %c13_i32 = arith.constant 13 : i32
    %5 = vector.broadcast %c13_i32 : i32 to vector<1x256xi32>
    %6 = arith.cmpi slt, %2, %5 : vector<1x256xi32>
    %c0 = arith.constant 0 : index
    %c0_0 = arith.constant 0 : index
    %c0_1 = arith.constant 0 : index
    %7 = vector.load %arg0[%c0, %c0_0, %c0_1] : memref<2x8x256xf32, #tpu.memory_space<vmem>>, vector<1x8x256xf32>
    %8 = vector.shape_cast %7 : vector<1x8x256xf32> to vector<8x256xf32>
    %c1 = arith.constant 1 : index
    %c0_2 = arith.constant 0 : index
    %c0_3 = arith.constant 0 : index
    %9 = vector.load %arg0[%c1, %c0_2, %c0_3] : memref<2x8x256xf32, #tpu.memory_space<vmem>>, vector<1x8x256xf32>
    %10 = vector.shape_cast %9 : vector<1x8x256xf32> to vector<8x256xf32>
    %c0_4 = arith.constant 0 : index
    %c0_5 = arith.constant 0 : index
    %11 = vector.load %arg2[%c0_4, %c0_5] : memref<8x1xf32, #tpu.memory_space<vmem>>, vector<8x1xf32>
    %c0_6 = arith.constant 0 : index
    %c0_7 = arith.constant 0 : index
    %12 = vector.load %arg3[%c0_6, %c0_7] : memref<8x1xf32, #tpu.memory_space<vmem>>, vector<8x1xf32>
    %cst = arith.constant 0.000000e+00 : f32
    %13 = vector.broadcast %cst : f32 to vector<8x128xf32>
    %14 = tpu.concatenate %13, %8, %13 in 1 : vector<8x128xf32>, vector<8x256xf32>, vector<8x128xf32> -> vector<8x512xf32>
    %cst_8 = arith.constant 0.000000e+00 : f32
    %15 = vector.broadcast %cst_8 : f32 to vector<8x256xf32>
    %16 = vector.extract_strided_slice %14 {offsets = [0, 77], sizes = [8, 256], strides = [1, 1]} : vector<8x512xf32> to vector<8x256xf32>
    %cst_9 = arith.constant 0.000000e+00 : f32
    %17 = vector.shape_cast %4 : vector<1x256xi1> to vector<1x256xi1>
    %18 = vector.broadcast %17 : vector<1x256xi1> to vector<8x256xi1>
    %19 = vector.broadcast %cst_9 : f32 to vector<8x256xf32>
    %20 = arith.select %18, %16, %19 : vector<8x256xi1>, vector<8x256xf32>
    %c0_10 = arith.constant 0 : index
    %c0_11 = arith.constant 0 : index
    %c0_12 = arith.constant 0 : index
    %c0_13 = arith.constant 0 : index
    %21 = vector.load %arg1[%c0_10, %c0_11, %c0_12, %c0_13] : memref<3x3x8x8xf32, #tpu.memory_space<vmem>>, vector<1x1x8x8xf32>
    %22 = vector.shape_cast %21 : vector<1x1x8x8xf32> to vector<8x8xf32>
    %cst_14 = arith.constant dense<0.000000e+00> : vector<8x256xf32>
    %23 = tpu.matmul %22, %20, %cst_14 {dimension_numbers = #tpu.dot_dimension_numbers<[1], [0], [0], [1], [0, 0, 1, 1], [], []>} : vector<8x8xf32>, vector<8x256xf32>, vector<8x256xf32> -> vector<8x256xf32>
    %24 = arith.addf %15, %23 : vector<8x256xf32>
    %25 = vector.extract_strided_slice %14 {offsets = [0, 80], sizes = [8, 256], strides = [1, 1]} : vector<8x512xf32> to vector<8x256xf32>
    %c0_15 = arith.constant 0 : index
    %c1_16 = arith.constant 1 : index
    %c0_17 = arith.constant 0 : index
    %c0_18 = arith.constant 0 : index
    %26 = vector.load %arg1[%c0_15, %c1_16, %c0_17, %c0_18] : memref<3x3x8x8xf32, #tpu.memory_space<vmem>>, vector<1x1x8x8xf32>
    %27 = vector.shape_cast %26 : vector<1x1x8x8xf32> to vector<8x8xf32>
    %cst_19 = arith.constant dense<0.000000e+00> : vector<8x256xf32>
    %28 = tpu.matmul %27, %25, %cst_19 {dimension_numbers = #tpu.dot_dimension_numbers<[1], [0], [0], [1], [0, 0, 1, 1], [], []>} : vector<8x8xf32>, vector<8x256xf32>, vector<8x256xf32> -> vector<8x256xf32>
    %29 = arith.addf %24, %28 : vector<8x256xf32>
    %30 = vector.extract_strided_slice %14 {offsets = [0, 83], sizes = [8, 256], strides = [1, 1]} : vector<8x512xf32> to vector<8x256xf32>
    %cst_20 = arith.constant 0.000000e+00 : f32
    %31 = vector.shape_cast %6 : vector<1x256xi1> to vector<1x256xi1>
    %32 = vector.broadcast %31 : vector<1x256xi1> to vector<8x256xi1>
    %33 = vector.broadcast %cst_20 : f32 to vector<8x256xf32>
    %34 = arith.select %32, %30, %33 : vector<8x256xi1>, vector<8x256xf32>
    %c0_21 = arith.constant 0 : index
    %c2 = arith.constant 2 : index
    %c0_22 = arith.constant 0 : index
    %c0_23 = arith.constant 0 : index
    %35 = vector.load %arg1[%c0_21, %c2, %c0_22, %c0_23] : memref<3x3x8x8xf32, #tpu.memory_space<vmem>>, vector<1x1x8x8xf32>
    %36 = vector.shape_cast %35 : vector<1x1x8x8xf32> to vector<8x8xf32>
    %cst_24 = arith.constant dense<0.000000e+00> : vector<8x256xf32>
    %37 = tpu.matmul %36, %34, %cst_24 {dimension_numbers = #tpu.dot_dimension_numbers<[1], [0], [0], [1], [0, 0, 1, 1], [], []>} : vector<8x8xf32>, vector<8x256xf32>, vector<8x256xf32> -> vector<8x256xf32>
    %38 = arith.addf %29, %37 : vector<8x256xf32>
    %39 = vector.extract_strided_slice %14 {offsets = [0, 125], sizes = [8, 256], strides = [1, 1]} : vector<8x512xf32> to vector<8x256xf32>
    %cst_25 = arith.constant 0.000000e+00 : f32
    %40 = vector.shape_cast %4 : vector<1x256xi1> to vector<1x256xi1>
    %41 = vector.broadcast %40 : vector<1x256xi1> to vector<8x256xi1>
    %42 = vector.broadcast %cst_25 : f32 to vector<8x256xf32>
    %43 = arith.select %41, %39, %42 : vector<8x256xi1>, vector<8x256xf32>
    %c1_26 = arith.constant 1 : index
    %c0_27 = arith.constant 0 : index
    %c0_28 = arith.constant 0 : index
    %c0_29 = arith.constant 0 : index
    %44 = vector.load %arg1[%c1_26, %c0_27, %c0_28, %c0_29] : memref<3x3x8x8xf32, #tpu.memory_space<vmem>>, vector<1x1x8x8xf32>
    %45 = vector.shape_cast %44 : vector<1x1x8x8xf32> to vector<8x8xf32>
    %cst_30 = arith.constant dense<0.000000e+00> : vector<8x256xf32>
    %46 = tpu.matmul %45, %43, %cst_30 {dimension_numbers = #tpu.dot_dimension_numbers<[1], [0], [0], [1], [0, 0, 1, 1], [], []>} : vector<8x8xf32>, vector<8x256xf32>, vector<8x256xf32> -> vector<8x256xf32>
    %47 = arith.addf %38, %46 : vector<8x256xf32>
    %48 = vector.extract_strided_slice %14 {offsets = [0, 128], sizes = [8, 256], strides = [1, 1]} : vector<8x512xf32> to vector<8x256xf32>
    %c1_31 = arith.constant 1 : index
    %c1_32 = arith.constant 1 : index
    %c0_33 = arith.constant 0 : index
    %c0_34 = arith.constant 0 : index
    %49 = vector.load %arg1[%c1_31, %c1_32, %c0_33, %c0_34] : memref<3x3x8x8xf32, #tpu.memory_space<vmem>>, vector<1x1x8x8xf32>
    %50 = vector.shape_cast %49 : vector<1x1x8x8xf32> to vector<8x8xf32>
    %cst_35 = arith.constant dense<0.000000e+00> : vector<8x256xf32>
    %51 = tpu.matmul %50, %48, %cst_35 {dimension_numbers = #tpu.dot_dimension_numbers<[1], [0], [0], [1], [0, 0, 1, 1], [], []>} : vector<8x8xf32>, vector<8x256xf32>, vector<8x256xf32> -> vector<8x256xf32>
    %52 = arith.addf %47, %51 : vector<8x256xf32>
    %53 = vector.extract_strided_slice %14 {offsets = [0, 131], sizes = [8, 256], strides = [1, 1]} : vector<8x512xf32> to vector<8x256xf32>
    %cst_36 = arith.constant 0.000000e+00 : f32
    %54 = vector.shape_cast %6 : vector<1x256xi1> to vector<1x256xi1>
    %55 = vector.broadcast %54 : vector<1x256xi1> to vector<8x256xi1>
    %56 = vector.broadcast %cst_36 : f32 to vector<8x256xf32>
    %57 = arith.select %55, %53, %56 : vector<8x256xi1>, vector<8x256xf32>
    %c1_37 = arith.constant 1 : index
    %c2_38 = arith.constant 2 : index
    %c0_39 = arith.constant 0 : index
    %c0_40 = arith.constant 0 : index
    %58 = vector.load %arg1[%c1_37, %c2_38, %c0_39, %c0_40] : memref<3x3x8x8xf32, #tpu.memory_space<vmem>>, vector<1x1x8x8xf32>
    %59 = vector.shape_cast %58 : vector<1x1x8x8xf32> to vector<8x8xf32>
    %cst_41 = arith.constant dense<0.000000e+00> : vector<8x256xf32>
    %60 = tpu.matmul %59, %57, %cst_41 {dimension_numbers = #tpu.dot_dimension_numbers<[1], [0], [0], [1], [0, 0, 1, 1], [], []>} : vector<8x8xf32>, vector<8x256xf32>, vector<8x256xf32> -> vector<8x256xf32>
    %61 = arith.addf %52, %60 : vector<8x256xf32>
    %62 = vector.extract_strided_slice %14 {offsets = [0, 173], sizes = [8, 256], strides = [1, 1]} : vector<8x512xf32> to vector<8x256xf32>
    %cst_42 = arith.constant 0.000000e+00 : f32
    %63 = vector.shape_cast %4 : vector<1x256xi1> to vector<1x256xi1>
    %64 = vector.broadcast %63 : vector<1x256xi1> to vector<8x256xi1>
    %65 = vector.broadcast %cst_42 : f32 to vector<8x256xf32>
    %66 = arith.select %64, %62, %65 : vector<8x256xi1>, vector<8x256xf32>
    %c2_43 = arith.constant 2 : index
    %c0_44 = arith.constant 0 : index
    %c0_45 = arith.constant 0 : index
    %c0_46 = arith.constant 0 : index
    %67 = vector.load %arg1[%c2_43, %c0_44, %c0_45, %c0_46] : memref<3x3x8x8xf32, #tpu.memory_space<vmem>>, vector<1x1x8x8xf32>
    %68 = vector.shape_cast %67 : vector<1x1x8x8xf32> to vector<8x8xf32>
    %cst_47 = arith.constant dense<0.000000e+00> : vector<8x256xf32>
    %69 = tpu.matmul %68, %66, %cst_47 {dimension_numbers = #tpu.dot_dimension_numbers<[1], [0], [0], [1], [0, 0, 1, 1], [], []>} : vector<8x8xf32>, vector<8x256xf32>, vector<8x256xf32> -> vector<8x256xf32>
    %70 = arith.addf %61, %69 : vector<8x256xf32>
    %71 = vector.extract_strided_slice %14 {offsets = [0, 176], sizes = [8, 256], strides = [1, 1]} : vector<8x512xf32> to vector<8x256xf32>
    %c2_48 = arith.constant 2 : index
    %c1_49 = arith.constant 1 : index
    %c0_50 = arith.constant 0 : index
    %c0_51 = arith.constant 0 : index
    %72 = vector.load %arg1[%c2_48, %c1_49, %c0_50, %c0_51] : memref<3x3x8x8xf32, #tpu.memory_space<vmem>>, vector<1x1x8x8xf32>
    %73 = vector.shape_cast %72 : vector<1x1x8x8xf32> to vector<8x8xf32>
    %cst_52 = arith.constant dense<0.000000e+00> : vector<8x256xf32>
    %74 = tpu.matmul %73, %71, %cst_52 {dimension_numbers = #tpu.dot_dimension_numbers<[1], [0], [0], [1], [0, 0, 1, 1], [], []>} : vector<8x8xf32>, vector<8x256xf32>, vector<8x256xf32> -> vector<8x256xf32>
    %75 = arith.addf %70, %74 : vector<8x256xf32>
    %76 = vector.extract_strided_slice %14 {offsets = [0, 179], sizes = [8, 256], strides = [1, 1]} : vector<8x512xf32> to vector<8x256xf32>
    %cst_53 = arith.constant 0.000000e+00 : f32
    %77 = vector.shape_cast %6 : vector<1x256xi1> to vector<1x256xi1>
    %78 = vector.broadcast %77 : vector<1x256xi1> to vector<8x256xi1>
    %79 = vector.broadcast %cst_53 : f32 to vector<8x256xf32>
    %80 = arith.select %78, %76, %79 : vector<8x256xi1>, vector<8x256xf32>
    %c2_54 = arith.constant 2 : index
    %c2_55 = arith.constant 2 : index
    %c0_56 = arith.constant 0 : index
    %c0_57 = arith.constant 0 : index
    %81 = vector.load %arg1[%c2_54, %c2_55, %c0_56, %c0_57] : memref<3x3x8x8xf32, #tpu.memory_space<vmem>>, vector<1x1x8x8xf32>
    %82 = vector.shape_cast %81 : vector<1x1x8x8xf32> to vector<8x8xf32>
    %cst_58 = arith.constant dense<0.000000e+00> : vector<8x256xf32>
    %83 = tpu.matmul %82, %80, %cst_58 {dimension_numbers = #tpu.dot_dimension_numbers<[1], [0], [0], [1], [0, 0, 1, 1], [], []>} : vector<8x8xf32>, vector<8x256xf32>, vector<8x256xf32> -> vector<8x256xf32>
    %84 = arith.addf %75, %83 : vector<8x256xf32>
    %85 = tpu.concatenate %13, %10, %13 in 1 : vector<8x128xf32>, vector<8x256xf32>, vector<8x128xf32> -> vector<8x512xf32>
    %cst_59 = arith.constant 0.000000e+00 : f32
    %86 = vector.broadcast %cst_59 : f32 to vector<8x256xf32>
    %87 = vector.extract_strided_slice %85 {offsets = [0, 77], sizes = [8, 256], strides = [1, 1]} : vector<8x512xf32> to vector<8x256xf32>
    %cst_60 = arith.constant 0.000000e+00 : f32
    %88 = vector.shape_cast %4 : vector<1x256xi1> to vector<1x256xi1>
    %89 = vector.broadcast %88 : vector<1x256xi1> to vector<8x256xi1>
    %90 = vector.broadcast %cst_60 : f32 to vector<8x256xf32>
    %91 = arith.select %89, %87, %90 : vector<8x256xi1>, vector<8x256xf32>
    %c0_61 = arith.constant 0 : index
    %c0_62 = arith.constant 0 : index
    %c0_63 = arith.constant 0 : index
    %c0_64 = arith.constant 0 : index
    %92 = vector.load %arg1[%c0_61, %c0_62, %c0_63, %c0_64] : memref<3x3x8x8xf32, #tpu.memory_space<vmem>>, vector<1x1x8x8xf32>
    %93 = vector.shape_cast %92 : vector<1x1x8x8xf32> to vector<8x8xf32>
    %cst_65 = arith.constant dense<0.000000e+00> : vector<8x256xf32>
    %94 = tpu.matmul %93, %91, %cst_65 {dimension_numbers = #tpu.dot_dimension_numbers<[1], [0], [0], [1], [0, 0, 1, 1], [], []>} : vector<8x8xf32>, vector<8x256xf32>, vector<8x256xf32> -> vector<8x256xf32>
    %95 = arith.addf %86, %94 : vector<8x256xf32>
    %96 = vector.extract_strided_slice %85 {offsets = [0, 80], sizes = [8, 256], strides = [1, 1]} : vector<8x512xf32> to vector<8x256xf32>
    %c0_66 = arith.constant 0 : index
    %c1_67 = arith.constant 1 : index
    %c0_68 = arith.constant 0 : index
    %c0_69 = arith.constant 0 : index
    %97 = vector.load %arg1[%c0_66, %c1_67, %c0_68, %c0_69] : memref<3x3x8x8xf32, #tpu.memory_space<vmem>>, vector<1x1x8x8xf32>
    %98 = vector.shape_cast %97 : vector<1x1x8x8xf32> to vector<8x8xf32>
    %cst_70 = arith.constant dense<0.000000e+00> : vector<8x256xf32>
    %99 = tpu.matmul %98, %96, %cst_70 {dimension_numbers = #tpu.dot_dimension_numbers<[1], [0], [0], [1], [0, 0, 1, 1], [], []>} : vector<8x8xf32>, vector<8x256xf32>, vector<8x256xf32> -> vector<8x256xf32>
    %100 = arith.addf %95, %99 : vector<8x256xf32>
    %101 = vector.extract_strided_slice %85 {offsets = [0, 83], sizes = [8, 256], strides = [1, 1]} : vector<8x512xf32> to vector<8x256xf32>
    %cst_71 = arith.constant 0.000000e+00 : f32
    %102 = vector.shape_cast %6 : vector<1x256xi1> to vector<1x256xi1>
    %103 = vector.broadcast %102 : vector<1x256xi1> to vector<8x256xi1>
    %104 = vector.broadcast %cst_71 : f32 to vector<8x256xf32>
    %105 = arith.select %103, %101, %104 : vector<8x256xi1>, vector<8x256xf32>
    %c0_72 = arith.constant 0 : index
    %c2_73 = arith.constant 2 : index
    %c0_74 = arith.constant 0 : index
    %c0_75 = arith.constant 0 : index
    %106 = vector.load %arg1[%c0_72, %c2_73, %c0_74, %c0_75] : memref<3x3x8x8xf32, #tpu.memory_space<vmem>>, vector<1x1x8x8xf32>
    %107 = vector.shape_cast %106 : vector<1x1x8x8xf32> to vector<8x8xf32>
    %cst_76 = arith.constant dense<0.000000e+00> : vector<8x256xf32>
    %108 = tpu.matmul %107, %105, %cst_76 {dimension_numbers = #tpu.dot_dimension_numbers<[1], [0], [0], [1], [0, 0, 1, 1], [], []>} : vector<8x8xf32>, vector<8x256xf32>, vector<8x256xf32> -> vector<8x256xf32>
    %109 = arith.addf %100, %108 : vector<8x256xf32>
    %110 = vector.extract_strided_slice %85 {offsets = [0, 125], sizes = [8, 256], strides = [1, 1]} : vector<8x512xf32> to vector<8x256xf32>
    %cst_77 = arith.constant 0.000000e+00 : f32
    %111 = vector.shape_cast %4 : vector<1x256xi1> to vector<1x256xi1>
    %112 = vector.broadcast %111 : vector<1x256xi1> to vector<8x256xi1>
    %113 = vector.broadcast %cst_77 : f32 to vector<8x256xf32>
    %114 = arith.select %112, %110, %113 : vector<8x256xi1>, vector<8x256xf32>
    %c1_78 = arith.constant 1 : index
    %c0_79 = arith.constant 0 : index
    %c0_80 = arith.constant 0 : index
    %c0_81 = arith.constant 0 : index
    %115 = vector.load %arg1[%c1_78, %c0_79, %c0_80, %c0_81] : memref<3x3x8x8xf32, #tpu.memory_space<vmem>>, vector<1x1x8x8xf32>
    %116 = vector.shape_cast %115 : vector<1x1x8x8xf32> to vector<8x8xf32>
    %cst_82 = arith.constant dense<0.000000e+00> : vector<8x256xf32>
    %117 = tpu.matmul %116, %114, %cst_82 {dimension_numbers = #tpu.dot_dimension_numbers<[1], [0], [0], [1], [0, 0, 1, 1], [], []>} : vector<8x8xf32>, vector<8x256xf32>, vector<8x256xf32> -> vector<8x256xf32>
    %118 = arith.addf %109, %117 : vector<8x256xf32>
    %119 = vector.extract_strided_slice %85 {offsets = [0, 128], sizes = [8, 256], strides = [1, 1]} : vector<8x512xf32> to vector<8x256xf32>
    %c1_83 = arith.constant 1 : index
    %c1_84 = arith.constant 1 : index
    %c0_85 = arith.constant 0 : index
    %c0_86 = arith.constant 0 : index
    %120 = vector.load %arg1[%c1_83, %c1_84, %c0_85, %c0_86] : memref<3x3x8x8xf32, #tpu.memory_space<vmem>>, vector<1x1x8x8xf32>
    %121 = vector.shape_cast %120 : vector<1x1x8x8xf32> to vector<8x8xf32>
    %cst_87 = arith.constant dense<0.000000e+00> : vector<8x256xf32>
    %122 = tpu.matmul %121, %119, %cst_87 {dimension_numbers = #tpu.dot_dimension_numbers<[1], [0], [0], [1], [0, 0, 1, 1], [], []>} : vector<8x8xf32>, vector<8x256xf32>, vector<8x256xf32> -> vector<8x256xf32>
    %123 = arith.addf %118, %122 : vector<8x256xf32>
    %124 = vector.extract_strided_slice %85 {offsets = [0, 131], sizes = [8, 256], strides = [1, 1]} : vector<8x512xf32> to vector<8x256xf32>
    %cst_88 = arith.constant 0.000000e+00 : f32
    %125 = vector.shape_cast %6 : vector<1x256xi1> to vector<1x256xi1>
    %126 = vector.broadcast %125 : vector<1x256xi1> to vector<8x256xi1>
    %127 = vector.broadcast %cst_88 : f32 to vector<8x256xf32>
    %128 = arith.select %126, %124, %127 : vector<8x256xi1>, vector<8x256xf32>
    %c1_89 = arith.constant 1 : index
    %c2_90 = arith.constant 2 : index
    %c0_91 = arith.constant 0 : index
    %c0_92 = arith.constant 0 : index
    %129 = vector.load %arg1[%c1_89, %c2_90, %c0_91, %c0_92] : memref<3x3x8x8xf32, #tpu.memory_space<vmem>>, vector<1x1x8x8xf32>
    %130 = vector.shape_cast %129 : vector<1x1x8x8xf32> to vector<8x8xf32>
    %cst_93 = arith.constant dense<0.000000e+00> : vector<8x256xf32>
    %131 = tpu.matmul %130, %128, %cst_93 {dimension_numbers = #tpu.dot_dimension_numbers<[1], [0], [0], [1], [0, 0, 1, 1], [], []>} : vector<8x8xf32>, vector<8x256xf32>, vector<8x256xf32> -> vector<8x256xf32>
    %132 = arith.addf %123, %131 : vector<8x256xf32>
    %133 = vector.extract_strided_slice %85 {offsets = [0, 173], sizes = [8, 256], strides = [1, 1]} : vector<8x512xf32> to vector<8x256xf32>
    %cst_94 = arith.constant 0.000000e+00 : f32
    %134 = vector.shape_cast %4 : vector<1x256xi1> to vector<1x256xi1>
    %135 = vector.broadcast %134 : vector<1x256xi1> to vector<8x256xi1>
    %136 = vector.broadcast %cst_94 : f32 to vector<8x256xf32>
    %137 = arith.select %135, %133, %136 : vector<8x256xi1>, vector<8x256xf32>
    %c2_95 = arith.constant 2 : index
    %c0_96 = arith.constant 0 : index
    %c0_97 = arith.constant 0 : index
    %c0_98 = arith.constant 0 : index
    %138 = vector.load %arg1[%c2_95, %c0_96, %c0_97, %c0_98] : memref<3x3x8x8xf32, #tpu.memory_space<vmem>>, vector<1x1x8x8xf32>
    %139 = vector.shape_cast %138 : vector<1x1x8x8xf32> to vector<8x8xf32>
    %cst_99 = arith.constant dense<0.000000e+00> : vector<8x256xf32>
    %140 = tpu.matmul %139, %137, %cst_99 {dimension_numbers = #tpu.dot_dimension_numbers<[1], [0], [0], [1], [0, 0, 1, 1], [], []>} : vector<8x8xf32>, vector<8x256xf32>, vector<8x256xf32> -> vector<8x256xf32>
    %141 = arith.addf %132, %140 : vector<8x256xf32>
    %142 = vector.extract_strided_slice %85 {offsets = [0, 176], sizes = [8, 256], strides = [1, 1]} : vector<8x512xf32> to vector<8x256xf32>
    %c2_100 = arith.constant 2 : index
    %c1_101 = arith.constant 1 : index
    %c0_102 = arith.constant 0 : index
    %c0_103 = arith.constant 0 : index
    %143 = vector.load %arg1[%c2_100, %c1_101, %c0_102, %c0_103] : memref<3x3x8x8xf32, #tpu.memory_space<vmem>>, vector<1x1x8x8xf32>
    %144 = vector.shape_cast %143 : vector<1x1x8x8xf32> to vector<8x8xf32>
    %cst_104 = arith.constant dense<0.000000e+00> : vector<8x256xf32>
    %145 = tpu.matmul %144, %142, %cst_104 {dimension_numbers = #tpu.dot_dimension_numbers<[1], [0], [0], [1], [0, 0, 1, 1], [], []>} : vector<8x8xf32>, vector<8x256xf32>, vector<8x256xf32> -> vector<8x256xf32>
    %146 = arith.addf %141, %145 : vector<8x256xf32>
    %147 = vector.extract_strided_slice %85 {offsets = [0, 179], sizes = [8, 256], strides = [1, 1]} : vector<8x512xf32> to vector<8x256xf32>
    %cst_105 = arith.constant 0.000000e+00 : f32
    %148 = vector.shape_cast %6 : vector<1x256xi1> to vector<1x256xi1>
    %149 = vector.broadcast %148 : vector<1x256xi1> to vector<8x256xi1>
    %150 = vector.broadcast %cst_105 : f32 to vector<8x256xf32>
    %151 = arith.select %149, %147, %150 : vector<8x256xi1>, vector<8x256xf32>
    %c2_106 = arith.constant 2 : index
    %c2_107 = arith.constant 2 : index
    %c0_108 = arith.constant 0 : index
    %c0_109 = arith.constant 0 : index
    %152 = vector.load %arg1[%c2_106, %c2_107, %c0_108, %c0_109] : memref<3x3x8x8xf32, #tpu.memory_space<vmem>>, vector<1x1x8x8xf32>
    %153 = vector.shape_cast %152 : vector<1x1x8x8xf32> to vector<8x8xf32>
    %cst_110 = arith.constant dense<0.000000e+00> : vector<8x256xf32>
    %154 = tpu.matmul %153, %151, %cst_110 {dimension_numbers = #tpu.dot_dimension_numbers<[1], [0], [0], [1], [0, 0, 1, 1], [], []>} : vector<8x8xf32>, vector<8x256xf32>, vector<8x256xf32> -> vector<8x256xf32>
    %155 = arith.addf %146, %154 : vector<8x256xf32>
    %cst_111 = arith.constant dense<0.000000e+00> : vector<8xf32>
    %156 = vector.multi_reduction <add>, %84, %cst_111 [1] : vector<8x256xf32> to vector<8xf32>
    %157 = vector.shape_cast %156 : vector<8xf32> to vector<8x1xf32>
    %158 = arith.mulf %84, %84 : vector<8x256xf32>
    %cst_112 = arith.constant dense<0.000000e+00> : vector<8xf32>
    %159 = vector.multi_reduction <add>, %158, %cst_112 [1] : vector<8x256xf32> to vector<8xf32>
    %160 = vector.shape_cast %159 : vector<8xf32> to vector<8x1xf32>
    %cst_113 = arith.constant dense<0.000000e+00> : vector<8xf32>
    %161 = vector.multi_reduction <add>, %155, %cst_113 [1] : vector<8x256xf32> to vector<8xf32>
    %162 = vector.shape_cast %161 : vector<8xf32> to vector<8x1xf32>
    %163 = arith.addf %157, %162 : vector<8x1xf32>
    %164 = arith.mulf %155, %155 : vector<8x256xf32>
    %cst_114 = arith.constant dense<0.000000e+00> : vector<8xf32>
    %165 = vector.multi_reduction <add>, %164, %cst_114 [1] : vector<8x256xf32> to vector<8xf32>
    %166 = vector.shape_cast %165 : vector<8xf32> to vector<8x1xf32>
    %167 = arith.addf %160, %166 : vector<8x1xf32>
    %cst_115 = arith.constant 5.120000e+02 : f32
    %168 = vector.broadcast %cst_115 : f32 to vector<8x1xf32>
    %169 = arith.divf %163, %168 : vector<8x1xf32>
    %cst_116 = arith.constant 5.120000e+02 : f32
    %170 = vector.broadcast %cst_116 : f32 to vector<8x1xf32>
    %171 = arith.divf %167, %170 : vector<8x1xf32>
    %172 = arith.mulf %169, %169 : vector<8x1xf32>
    %173 = arith.subf %171, %172 : vector<8x1xf32>
    %cst_117 = arith.constant 0.000000e+00 : f32
    %174 = vector.broadcast %cst_117 : f32 to vector<8x1xf32>
    %175 = arith.maximumf %173, %174 : vector<8x1xf32>
    %cst_118 = arith.constant 9.99999974E-6 : f32
    %176 = vector.broadcast %cst_118 : f32 to vector<8x1xf32>
    %177 = arith.addf %175, %176 : vector<8x1xf32>
    %178 = math.rsqrt %177 : vector<8x1xf32>
    %179 = arith.mulf %11, %178 : vector<8x1xf32>
    %180 = arith.mulf %169, %179 : vector<8x1xf32>
    %181 = arith.subf %12, %180 : vector<8x1xf32>
    %182 = vector.broadcast %179 : vector<8x1xf32> to vector<8x256xf32>
    %183 = arith.mulf %84, %182 : vector<8x256xf32>
    %184 = vector.broadcast %181 : vector<8x1xf32> to vector<8x256xf32>
    %185 = arith.addf %183, %184 : vector<8x256xf32>
    %cst_119 = arith.constant 0.000000e+00 : f32
    %186 = vector.broadcast %cst_119 : f32 to vector<8x256xf32>
    %187 = arith.maximumf %185, %186 : vector<8x256xf32>
    %188 = vector.broadcast %179 : vector<8x1xf32> to vector<8x256xf32>
    %189 = arith.mulf %155, %188 : vector<8x256xf32>
    %190 = vector.broadcast %181 : vector<8x1xf32> to vector<8x256xf32>
    %191 = arith.addf %189, %190 : vector<8x256xf32>
    %cst_120 = arith.constant 0.000000e+00 : f32
    %192 = vector.broadcast %cst_120 : f32 to vector<8x256xf32>
    %193 = arith.maximumf %191, %192 : vector<8x256xf32>
    %c0_121 = arith.constant 0 : index
    %c0_122 = arith.constant 0 : index
    %194 = vector.load %arg5[%c0_121, %c0_122] : memref<8x1xf32, #tpu.memory_space<vmem>>, vector<8x1xf32>
    %c0_123 = arith.constant 0 : index
    %c0_124 = arith.constant 0 : index
    %195 = vector.load %arg6[%c0_123, %c0_124] : memref<8x1xf32, #tpu.memory_space<vmem>>, vector<8x1xf32>
    %cst_125 = arith.constant 0.000000e+00 : f32
    %196 = vector.broadcast %cst_125 : f32 to vector<8x128xf32>
    %197 = tpu.concatenate %196, %187, %196 in 1 : vector<8x128xf32>, vector<8x256xf32>, vector<8x128xf32> -> vector<8x512xf32>
    %cst_126 = arith.constant 0.000000e+00 : f32
    %198 = vector.broadcast %cst_126 : f32 to vector<8x256xf32>
    %199 = vector.extract_strided_slice %197 {offsets = [0, 77], sizes = [8, 256], strides = [1, 1]} : vector<8x512xf32> to vector<8x256xf32>
    %cst_127 = arith.constant 0.000000e+00 : f32
    %200 = vector.shape_cast %4 : vector<1x256xi1> to vector<1x256xi1>
    %201 = vector.broadcast %200 : vector<1x256xi1> to vector<8x256xi1>
    %202 = vector.broadcast %cst_127 : f32 to vector<8x256xf32>
    %203 = arith.select %201, %199, %202 : vector<8x256xi1>, vector<8x256xf32>
    %c0_128 = arith.constant 0 : index
    %c0_129 = arith.constant 0 : index
    %c0_130 = arith.constant 0 : index
    %c0_131 = arith.constant 0 : index
    %204 = vector.load %arg4[%c0_128, %c0_129, %c0_130, %c0_131] : memref<3x3x8x8xf32, #tpu.memory_space<vmem>>, vector<1x1x8x8xf32>
    %205 = vector.shape_cast %204 : vector<1x1x8x8xf32> to vector<8x8xf32>
    %cst_132 = arith.constant dense<0.000000e+00> : vector<8x256xf32>
    %206 = tpu.matmul %205, %203, %cst_132 {dimension_numbers = #tpu.dot_dimension_numbers<[1], [0], [0], [1], [0, 0, 1, 1], [], []>} : vector<8x8xf32>, vector<8x256xf32>, vector<8x256xf32> -> vector<8x256xf32>
    %207 = arith.addf %198, %206 : vector<8x256xf32>
    %208 = vector.extract_strided_slice %197 {offsets = [0, 80], sizes = [8, 256], strides = [1, 1]} : vector<8x512xf32> to vector<8x256xf32>
    %c0_133 = arith.constant 0 : index
    %c1_134 = arith.constant 1 : index
    %c0_135 = arith.constant 0 : index
    %c0_136 = arith.constant 0 : index
    %209 = vector.load %arg4[%c0_133, %c1_134, %c0_135, %c0_136] : memref<3x3x8x8xf32, #tpu.memory_space<vmem>>, vector<1x1x8x8xf32>
    %210 = vector.shape_cast %209 : vector<1x1x8x8xf32> to vector<8x8xf32>
    %cst_137 = arith.constant dense<0.000000e+00> : vector<8x256xf32>
    %211 = tpu.matmul %210, %208, %cst_137 {dimension_numbers = #tpu.dot_dimension_numbers<[1], [0], [0], [1], [0, 0, 1, 1], [], []>} : vector<8x8xf32>, vector<8x256xf32>, vector<8x256xf32> -> vector<8x256xf32>
    %212 = arith.addf %207, %211 : vector<8x256xf32>
    %213 = vector.extract_strided_slice %197 {offsets = [0, 83], sizes = [8, 256], strides = [1, 1]} : vector<8x512xf32> to vector<8x256xf32>
    %cst_138 = arith.constant 0.000000e+00 : f32
    %214 = vector.shape_cast %6 : vector<1x256xi1> to vector<1x256xi1>
    %215 = vector.broadcast %214 : vector<1x256xi1> to vector<8x256xi1>
    %216 = vector.broadcast %cst_138 : f32 to vector<8x256xf32>
    %217 = arith.select %215, %213, %216 : vector<8x256xi1>, vector<8x256xf32>
    %c0_139 = arith.constant 0 : index
    %c2_140 = arith.constant 2 : index
    %c0_141 = arith.constant 0 : index
    %c0_142 = arith.constant 0 : index
    %218 = vector.load %arg4[%c0_139, %c2_140, %c0_141, %c0_142] : memref<3x3x8x8xf32, #tpu.memory_space<vmem>>, vector<1x1x8x8xf32>
    %219 = vector.shape_cast %218 : vector<1x1x8x8xf32> to vector<8x8xf32>
    %cst_143 = arith.constant dense<0.000000e+00> : vector<8x256xf32>
    %220 = tpu.matmul %219, %217, %cst_143 {dimension_numbers = #tpu.dot_dimension_numbers<[1], [0], [0], [1], [0, 0, 1, 1], [], []>} : vector<8x8xf32>, vector<8x256xf32>, vector<8x256xf32> -> vector<8x256xf32>
    %221 = arith.addf %212, %220 : vector<8x256xf32>
    %222 = vector.extract_strided_slice %197 {offsets = [0, 125], sizes = [8, 256], strides = [1, 1]} : vector<8x512xf32> to vector<8x256xf32>
    %cst_144 = arith.constant 0.000000e+00 : f32
    %223 = vector.shape_cast %4 : vector<1x256xi1> to vector<1x256xi1>
    %224 = vector.broadcast %223 : vector<1x256xi1> to vector<8x256xi1>
    %225 = vector.broadcast %cst_144 : f32 to vector<8x256xf32>
    %226 = arith.select %224, %222, %225 : vector<8x256xi1>, vector<8x256xf32>
    %c1_145 = arith.constant 1 : index
    %c0_146 = arith.constant 0 : index
    %c0_147 = arith.constant 0 : index
    %c0_148 = arith.constant 0 : index
    %227 = vector.load %arg4[%c1_145, %c0_146, %c0_147, %c0_148] : memref<3x3x8x8xf32, #tpu.memory_space<vmem>>, vector<1x1x8x8xf32>
    %228 = vector.shape_cast %227 : vector<1x1x8x8xf32> to vector<8x8xf32>
    %cst_149 = arith.constant dense<0.000000e+00> : vector<8x256xf32>
    %229 = tpu.matmul %228, %226, %cst_149 {dimension_numbers = #tpu.dot_dimension_numbers<[1], [0], [0], [1], [0, 0, 1, 1], [], []>} : vector<8x8xf32>, vector<8x256xf32>, vector<8x256xf32> -> vector<8x256xf32>
    %230 = arith.addf %221, %229 : vector<8x256xf32>
    %231 = vector.extract_strided_slice %197 {offsets = [0, 128], sizes = [8, 256], strides = [1, 1]} : vector<8x512xf32> to vector<8x256xf32>
    %c1_150 = arith.constant 1 : index
    %c1_151 = arith.constant 1 : index
    %c0_152 = arith.constant 0 : index
    %c0_153 = arith.constant 0 : index
    %232 = vector.load %arg4[%c1_150, %c1_151, %c0_152, %c0_153] : memref<3x3x8x8xf32, #tpu.memory_space<vmem>>, vector<1x1x8x8xf32>
    %233 = vector.shape_cast %232 : vector<1x1x8x8xf32> to vector<8x8xf32>
    %cst_154 = arith.constant dense<0.000000e+00> : vector<8x256xf32>
    %234 = tpu.matmul %233, %231, %cst_154 {dimension_numbers = #tpu.dot_dimension_numbers<[1], [0], [0], [1], [0, 0, 1, 1], [], []>} : vector<8x8xf32>, vector<8x256xf32>, vector<8x256xf32> -> vector<8x256xf32>
    %235 = arith.addf %230, %234 : vector<8x256xf32>
    %236 = vector.extract_strided_slice %197 {offsets = [0, 131], sizes = [8, 256], strides = [1, 1]} : vector<8x512xf32> to vector<8x256xf32>
    %cst_155 = arith.constant 0.000000e+00 : f32
    %237 = vector.shape_cast %6 : vector<1x256xi1> to vector<1x256xi1>
    %238 = vector.broadcast %237 : vector<1x256xi1> to vector<8x256xi1>
    %239 = vector.broadcast %cst_155 : f32 to vector<8x256xf32>
    %240 = arith.select %238, %236, %239 : vector<8x256xi1>, vector<8x256xf32>
    %c1_156 = arith.constant 1 : index
    %c2_157 = arith.constant 2 : index
    %c0_158 = arith.constant 0 : index
    %c0_159 = arith.constant 0 : index
    %241 = vector.load %arg4[%c1_156, %c2_157, %c0_158, %c0_159] : memref<3x3x8x8xf32, #tpu.memory_space<vmem>>, vector<1x1x8x8xf32>
    %242 = vector.shape_cast %241 : vector<1x1x8x8xf32> to vector<8x8xf32>
    %cst_160 = arith.constant dense<0.000000e+00> : vector<8x256xf32>
    %243 = tpu.matmul %242, %240, %cst_160 {dimension_numbers = #tpu.dot_dimension_numbers<[1], [0], [0], [1], [0, 0, 1, 1], [], []>} : vector<8x8xf32>, vector<8x256xf32>, vector<8x256xf32> -> vector<8x256xf32>
    %244 = arith.addf %235, %243 : vector<8x256xf32>
    %245 = vector.extract_strided_slice %197 {offsets = [0, 173], sizes = [8, 256], strides = [1, 1]} : vector<8x512xf32> to vector<8x256xf32>
    %cst_161 = arith.constant 0.000000e+00 : f32
    %246 = vector.shape_cast %4 : vector<1x256xi1> to vector<1x256xi1>
    %247 = vector.broadcast %246 : vector<1x256xi1> to vector<8x256xi1>
    %248 = vector.broadcast %cst_161 : f32 to vector<8x256xf32>
    %249 = arith.select %247, %245, %248 : vector<8x256xi1>, vector<8x256xf32>
    %c2_162 = arith.constant 2 : index
    %c0_163 = arith.constant 0 : index
    %c0_164 = arith.constant 0 : index
    %c0_165 = arith.constant 0 : index
    %250 = vector.load %arg4[%c2_162, %c0_163, %c0_164, %c0_165] : memref<3x3x8x8xf32, #tpu.memory_space<vmem>>, vector<1x1x8x8xf32>
    %251 = vector.shape_cast %250 : vector<1x1x8x8xf32> to vector<8x8xf32>
    %cst_166 = arith.constant dense<0.000000e+00> : vector<8x256xf32>
    %252 = tpu.matmul %251, %249, %cst_166 {dimension_numbers = #tpu.dot_dimension_numbers<[1], [0], [0], [1], [0, 0, 1, 1], [], []>} : vector<8x8xf32>, vector<8x256xf32>, vector<8x256xf32> -> vector<8x256xf32>
    %253 = arith.addf %244, %252 : vector<8x256xf32>
    %254 = vector.extract_strided_slice %197 {offsets = [0, 176], sizes = [8, 256], strides = [1, 1]} : vector<8x512xf32> to vector<8x256xf32>
    %c2_167 = arith.constant 2 : index
    %c1_168 = arith.constant 1 : index
    %c0_169 = arith.constant 0 : index
    %c0_170 = arith.constant 0 : index
    %255 = vector.load %arg4[%c2_167, %c1_168, %c0_169, %c0_170] : memref<3x3x8x8xf32, #tpu.memory_space<vmem>>, vector<1x1x8x8xf32>
    %256 = vector.shape_cast %255 : vector<1x1x8x8xf32> to vector<8x8xf32>
    %cst_171 = arith.constant dense<0.000000e+00> : vector<8x256xf32>
    %257 = tpu.matmul %256, %254, %cst_171 {dimension_numbers = #tpu.dot_dimension_numbers<[1], [0], [0], [1], [0, 0, 1, 1], [], []>} : vector<8x8xf32>, vector<8x256xf32>, vector<8x256xf32> -> vector<8x256xf32>
    %258 = arith.addf %253, %257 : vector<8x256xf32>
    %259 = vector.extract_strided_slice %197 {offsets = [0, 179], sizes = [8, 256], strides = [1, 1]} : vector<8x512xf32> to vector<8x256xf32>
    %cst_172 = arith.constant 0.000000e+00 : f32
    %260 = vector.shape_cast %6 : vector<1x256xi1> to vector<1x256xi1>
    %261 = vector.broadcast %260 : vector<1x256xi1> to vector<8x256xi1>
    %262 = vector.broadcast %cst_172 : f32 to vector<8x256xf32>
    %263 = arith.select %261, %259, %262 : vector<8x256xi1>, vector<8x256xf32>
    %c2_173 = arith.constant 2 : index
    %c2_174 = arith.constant 2 : index
    %c0_175 = arith.constant 0 : index
    %c0_176 = arith.constant 0 : index
    %264 = vector.load %arg4[%c2_173, %c2_174, %c0_175, %c0_176] : memref<3x3x8x8xf32, #tpu.memory_space<vmem>>, vector<1x1x8x8xf32>
    %265 = vector.shape_cast %264 : vector<1x1x8x8xf32> to vector<8x8xf32>
    %cst_177 = arith.constant dense<0.000000e+00> : vector<8x256xf32>
    %266 = tpu.matmul %265, %263, %cst_177 {dimension_numbers = #tpu.dot_dimension_numbers<[1], [0], [0], [1], [0, 0, 1, 1], [], []>} : vector<8x8xf32>, vector<8x256xf32>, vector<8x256xf32> -> vector<8x256xf32>
    %267 = arith.addf %258, %266 : vector<8x256xf32>
    %268 = tpu.concatenate %196, %193, %196 in 1 : vector<8x128xf32>, vector<8x256xf32>, vector<8x128xf32> -> vector<8x512xf32>
    %cst_178 = arith.constant 0.000000e+00 : f32
    %269 = vector.broadcast %cst_178 : f32 to vector<8x256xf32>
    %270 = vector.extract_strided_slice %268 {offsets = [0, 77], sizes = [8, 256], strides = [1, 1]} : vector<8x512xf32> to vector<8x256xf32>
    %cst_179 = arith.constant 0.000000e+00 : f32
    %271 = vector.shape_cast %4 : vector<1x256xi1> to vector<1x256xi1>
    %272 = vector.broadcast %271 : vector<1x256xi1> to vector<8x256xi1>
    %273 = vector.broadcast %cst_179 : f32 to vector<8x256xf32>
    %274 = arith.select %272, %270, %273 : vector<8x256xi1>, vector<8x256xf32>
    %c0_180 = arith.constant 0 : index
    %c0_181 = arith.constant 0 : index
    %c0_182 = arith.constant 0 : index
    %c0_183 = arith.constant 0 : index
    %275 = vector.load %arg4[%c0_180, %c0_181, %c0_182, %c0_183] : memref<3x3x8x8xf32, #tpu.memory_space<vmem>>, vector<1x1x8x8xf32>
    %276 = vector.shape_cast %275 : vector<1x1x8x8xf32> to vector<8x8xf32>
    %cst_184 = arith.constant dense<0.000000e+00> : vector<8x256xf32>
    %277 = tpu.matmul %276, %274, %cst_184 {dimension_numbers = #tpu.dot_dimension_numbers<[1], [0], [0], [1], [0, 0, 1, 1], [], []>} : vector<8x8xf32>, vector<8x256xf32>, vector<8x256xf32> -> vector<8x256xf32>
    %278 = arith.addf %269, %277 : vector<8x256xf32>
    %279 = vector.extract_strided_slice %268 {offsets = [0, 80], sizes = [8, 256], strides = [1, 1]} : vector<8x512xf32> to vector<8x256xf32>
    %c0_185 = arith.constant 0 : index
    %c1_186 = arith.constant 1 : index
    %c0_187 = arith.constant 0 : index
    %c0_188 = arith.constant 0 : index
    %280 = vector.load %arg4[%c0_185, %c1_186, %c0_187, %c0_188] : memref<3x3x8x8xf32, #tpu.memory_space<vmem>>, vector<1x1x8x8xf32>
    %281 = vector.shape_cast %280 : vector<1x1x8x8xf32> to vector<8x8xf32>
    %cst_189 = arith.constant dense<0.000000e+00> : vector<8x256xf32>
    %282 = tpu.matmul %281, %279, %cst_189 {dimension_numbers = #tpu.dot_dimension_numbers<[1], [0], [0], [1], [0, 0, 1, 1], [], []>} : vector<8x8xf32>, vector<8x256xf32>, vector<8x256xf32> -> vector<8x256xf32>
    %283 = arith.addf %278, %282 : vector<8x256xf32>
    %284 = vector.extract_strided_slice %268 {offsets = [0, 83], sizes = [8, 256], strides = [1, 1]} : vector<8x512xf32> to vector<8x256xf32>
    %cst_190 = arith.constant 0.000000e+00 : f32
    %285 = vector.shape_cast %6 : vector<1x256xi1> to vector<1x256xi1>
    %286 = vector.broadcast %285 : vector<1x256xi1> to vector<8x256xi1>
    %287 = vector.broadcast %cst_190 : f32 to vector<8x256xf32>
    %288 = arith.select %286, %284, %287 : vector<8x256xi1>, vector<8x256xf32>
    %c0_191 = arith.constant 0 : index
    %c2_192 = arith.constant 2 : index
    %c0_193 = arith.constant 0 : index
    %c0_194 = arith.constant 0 : index
    %289 = vector.load %arg4[%c0_191, %c2_192, %c0_193, %c0_194] : memref<3x3x8x8xf32, #tpu.memory_space<vmem>>, vector<1x1x8x8xf32>
    %290 = vector.shape_cast %289 : vector<1x1x8x8xf32> to vector<8x8xf32>
    %cst_195 = arith.constant dense<0.000000e+00> : vector<8x256xf32>
    %291 = tpu.matmul %290, %288, %cst_195 {dimension_numbers = #tpu.dot_dimension_numbers<[1], [0], [0], [1], [0, 0, 1, 1], [], []>} : vector<8x8xf32>, vector<8x256xf32>, vector<8x256xf32> -> vector<8x256xf32>
    %292 = arith.addf %283, %291 : vector<8x256xf32>
    %293 = vector.extract_strided_slice %268 {offsets = [0, 125], sizes = [8, 256], strides = [1, 1]} : vector<8x512xf32> to vector<8x256xf32>
    %cst_196 = arith.constant 0.000000e+00 : f32
    %294 = vector.shape_cast %4 : vector<1x256xi1> to vector<1x256xi1>
    %295 = vector.broadcast %294 : vector<1x256xi1> to vector<8x256xi1>
    %296 = vector.broadcast %cst_196 : f32 to vector<8x256xf32>
    %297 = arith.select %295, %293, %296 : vector<8x256xi1>, vector<8x256xf32>
    %c1_197 = arith.constant 1 : index
    %c0_198 = arith.constant 0 : index
    %c0_199 = arith.constant 0 : index
    %c0_200 = arith.constant 0 : index
    %298 = vector.load %arg4[%c1_197, %c0_198, %c0_199, %c0_200] : memref<3x3x8x8xf32, #tpu.memory_space<vmem>>, vector<1x1x8x8xf32>
    %299 = vector.shape_cast %298 : vector<1x1x8x8xf32> to vector<8x8xf32>
    %cst_201 = arith.constant dense<0.000000e+00> : vector<8x256xf32>
    %300 = tpu.matmul %299, %297, %cst_201 {dimension_numbers = #tpu.dot_dimension_numbers<[1], [0], [0], [1], [0, 0, 1, 1], [], []>} : vector<8x8xf32>, vector<8x256xf32>, vector<8x256xf32> -> vector<8x256xf32>
    %301 = arith.addf %292, %300 : vector<8x256xf32>
    %302 = vector.extract_strided_slice %268 {offsets = [0, 128], sizes = [8, 256], strides = [1, 1]} : vector<8x512xf32> to vector<8x256xf32>
    %c1_202 = arith.constant 1 : index
    %c1_203 = arith.constant 1 : index
    %c0_204 = arith.constant 0 : index
    %c0_205 = arith.constant 0 : index
    %303 = vector.load %arg4[%c1_202, %c1_203, %c0_204, %c0_205] : memref<3x3x8x8xf32, #tpu.memory_space<vmem>>, vector<1x1x8x8xf32>
    %304 = vector.shape_cast %303 : vector<1x1x8x8xf32> to vector<8x8xf32>
    %cst_206 = arith.constant dense<0.000000e+00> : vector<8x256xf32>
    %305 = tpu.matmul %304, %302, %cst_206 {dimension_numbers = #tpu.dot_dimension_numbers<[1], [0], [0], [1], [0, 0, 1, 1], [], []>} : vector<8x8xf32>, vector<8x256xf32>, vector<8x256xf32> -> vector<8x256xf32>
    %306 = arith.addf %301, %305 : vector<8x256xf32>
    %307 = vector.extract_strided_slice %268 {offsets = [0, 131], sizes = [8, 256], strides = [1, 1]} : vector<8x512xf32> to vector<8x256xf32>
    %cst_207 = arith.constant 0.000000e+00 : f32
    %308 = vector.shape_cast %6 : vector<1x256xi1> to vector<1x256xi1>
    %309 = vector.broadcast %308 : vector<1x256xi1> to vector<8x256xi1>
    %310 = vector.broadcast %cst_207 : f32 to vector<8x256xf32>
    %311 = arith.select %309, %307, %310 : vector<8x256xi1>, vector<8x256xf32>
    %c1_208 = arith.constant 1 : index
    %c2_209 = arith.constant 2 : index
    %c0_210 = arith.constant 0 : index
    %c0_211 = arith.constant 0 : index
    %312 = vector.load %arg4[%c1_208, %c2_209, %c0_210, %c0_211] : memref<3x3x8x8xf32, #tpu.memory_space<vmem>>, vector<1x1x8x8xf32>
    %313 = vector.shape_cast %312 : vector<1x1x8x8xf32> to vector<8x8xf32>
    %cst_212 = arith.constant dense<0.000000e+00> : vector<8x256xf32>
    %314 = tpu.matmul %313, %311, %cst_212 {dimension_numbers = #tpu.dot_dimension_numbers<[1], [0], [0], [1], [0, 0, 1, 1], [], []>} : vector<8x8xf32>, vector<8x256xf32>, vector<8x256xf32> -> vector<8x256xf32>
    %315 = arith.addf %306, %314 : vector<8x256xf32>
    %316 = vector.extract_strided_slice %268 {offsets = [0, 173], sizes = [8, 256], strides = [1, 1]} : vector<8x512xf32> to vector<8x256xf32>
    %cst_213 = arith.constant 0.000000e+00 : f32
    %317 = vector.shape_cast %4 : vector<1x256xi1> to vector<1x256xi1>
    %318 = vector.broadcast %317 : vector<1x256xi1> to vector<8x256xi1>
    %319 = vector.broadcast %cst_213 : f32 to vector<8x256xf32>
    %320 = arith.select %318, %316, %319 : vector<8x256xi1>, vector<8x256xf32>
    %c2_214 = arith.constant 2 : index
    %c0_215 = arith.constant 0 : index
    %c0_216 = arith.constant 0 : index
    %c0_217 = arith.constant 0 : index
    %321 = vector.load %arg4[%c2_214, %c0_215, %c0_216, %c0_217] : memref<3x3x8x8xf32, #tpu.memory_space<vmem>>, vector<1x1x8x8xf32>
    %322 = vector.shape_cast %321 : vector<1x1x8x8xf32> to vector<8x8xf32>
    %cst_218 = arith.constant dense<0.000000e+00> : vector<8x256xf32>
    %323 = tpu.matmul %322, %320, %cst_218 {dimension_numbers = #tpu.dot_dimension_numbers<[1], [0], [0], [1], [0, 0, 1, 1], [], []>} : vector<8x8xf32>, vector<8x256xf32>, vector<8x256xf32> -> vector<8x256xf32>
    %324 = arith.addf %315, %323 : vector<8x256xf32>
    %325 = vector.extract_strided_slice %268 {offsets = [0, 176], sizes = [8, 256], strides = [1, 1]} : vector<8x512xf32> to vector<8x256xf32>
    %c2_219 = arith.constant 2 : index
    %c1_220 = arith.constant 1 : index
    %c0_221 = arith.constant 0 : index
    %c0_222 = arith.constant 0 : index
    %326 = vector.load %arg4[%c2_219, %c1_220, %c0_221, %c0_222] : memref<3x3x8x8xf32, #tpu.memory_space<vmem>>, vector<1x1x8x8xf32>
    %327 = vector.shape_cast %326 : vector<1x1x8x8xf32> to vector<8x8xf32>
    %cst_223 = arith.constant dense<0.000000e+00> : vector<8x256xf32>
    %328 = tpu.matmul %327, %325, %cst_223 {dimension_numbers = #tpu.dot_dimension_numbers<[1], [0], [0], [1], [0, 0, 1, 1], [], []>} : vector<8x8xf32>, vector<8x256xf32>, vector<8x256xf32> -> vector<8x256xf32>
    %329 = arith.addf %324, %328 : vector<8x256xf32>
    %330 = vector.extract_strided_slice %268 {offsets = [0, 179], sizes = [8, 256], strides = [1, 1]} : vector<8x512xf32> to vector<8x256xf32>
    %cst_224 = arith.constant 0.000000e+00 : f32
    %331 = vector.shape_cast %6 : vector<1x256xi1> to vector<1x256xi1>
    %332 = vector.broadcast %331 : vector<1x256xi1> to vector<8x256xi1>
    %333 = vector.broadcast %cst_224 : f32 to vector<8x256xf32>
    %334 = arith.select %332, %330, %333 : vector<8x256xi1>, vector<8x256xf32>
    %c2_225 = arith.constant 2 : index
    %c2_226 = arith.constant 2 : index
    %c0_227 = arith.constant 0 : index
    %c0_228 = arith.constant 0 : index
    %335 = vector.load %arg4[%c2_225, %c2_226, %c0_227, %c0_228] : memref<3x3x8x8xf32, #tpu.memory_space<vmem>>, vector<1x1x8x8xf32>
    %336 = vector.shape_cast %335 : vector<1x1x8x8xf32> to vector<8x8xf32>
    %cst_229 = arith.constant dense<0.000000e+00> : vector<8x256xf32>
    %337 = tpu.matmul %336, %334, %cst_229 {dimension_numbers = #tpu.dot_dimension_numbers<[1], [0], [0], [1], [0, 0, 1, 1], [], []>} : vector<8x8xf32>, vector<8x256xf32>, vector<8x256xf32> -> vector<8x256xf32>
    %338 = arith.addf %329, %337 : vector<8x256xf32>
    %cst_230 = arith.constant dense<0.000000e+00> : vector<8xf32>
    %339 = vector.multi_reduction <add>, %267, %cst_230 [1] : vector<8x256xf32> to vector<8xf32>
    %340 = vector.shape_cast %339 : vector<8xf32> to vector<8x1xf32>
    %341 = arith.mulf %267, %267 : vector<8x256xf32>
    %cst_231 = arith.constant dense<0.000000e+00> : vector<8xf32>
    %342 = vector.multi_reduction <add>, %341, %cst_231 [1] : vector<8x256xf32> to vector<8xf32>
    %343 = vector.shape_cast %342 : vector<8xf32> to vector<8x1xf32>
    %cst_232 = arith.constant dense<0.000000e+00> : vector<8xf32>
    %344 = vector.multi_reduction <add>, %338, %cst_232 [1] : vector<8x256xf32> to vector<8xf32>
    %345 = vector.shape_cast %344 : vector<8xf32> to vector<8x1xf32>
    %346 = arith.addf %340, %345 : vector<8x1xf32>
    %347 = arith.mulf %338, %338 : vector<8x256xf32>
    %cst_233 = arith.constant dense<0.000000e+00> : vector<8xf32>
    %348 = vector.multi_reduction <add>, %347, %cst_233 [1] : vector<8x256xf32> to vector<8xf32>
    %349 = vector.shape_cast %348 : vector<8xf32> to vector<8x1xf32>
    %350 = arith.addf %343, %349 : vector<8x1xf32>
    %cst_234 = arith.constant 5.120000e+02 : f32
    %351 = vector.broadcast %cst_234 : f32 to vector<8x1xf32>
    %352 = arith.divf %346, %351 : vector<8x1xf32>
    %cst_235 = arith.constant 5.120000e+02 : f32
    %353 = vector.broadcast %cst_235 : f32 to vector<8x1xf32>
    %354 = arith.divf %350, %353 : vector<8x1xf32>
    %355 = arith.mulf %352, %352 : vector<8x1xf32>
    %356 = arith.subf %354, %355 : vector<8x1xf32>
    %cst_236 = arith.constant 0.000000e+00 : f32
    %357 = vector.broadcast %cst_236 : f32 to vector<8x1xf32>
    %358 = arith.maximumf %356, %357 : vector<8x1xf32>
    %cst_237 = arith.constant 9.99999974E-6 : f32
    %359 = vector.broadcast %cst_237 : f32 to vector<8x1xf32>
    %360 = arith.addf %358, %359 : vector<8x1xf32>
    %361 = math.rsqrt %360 : vector<8x1xf32>
    %362 = arith.mulf %194, %361 : vector<8x1xf32>
    %363 = arith.mulf %352, %362 : vector<8x1xf32>
    %364 = arith.subf %195, %363 : vector<8x1xf32>
    %365 = vector.broadcast %362 : vector<8x1xf32> to vector<8x256xf32>
    %366 = arith.mulf %267, %365 : vector<8x256xf32>
    %367 = vector.broadcast %364 : vector<8x1xf32> to vector<8x256xf32>
    %368 = arith.addf %366, %367 : vector<8x256xf32>
    %cst_238 = arith.constant 0.000000e+00 : f32
    %369 = vector.broadcast %cst_238 : f32 to vector<8x256xf32>
    %370 = arith.maximumf %368, %369 : vector<8x256xf32>
    %371 = vector.broadcast %362 : vector<8x1xf32> to vector<8x256xf32>
    %372 = arith.mulf %338, %371 : vector<8x256xf32>
    %373 = vector.broadcast %364 : vector<8x1xf32> to vector<8x256xf32>
    %374 = arith.addf %372, %373 : vector<8x256xf32>
    %cst_239 = arith.constant 0.000000e+00 : f32
    %375 = vector.broadcast %cst_239 : f32 to vector<8x256xf32>
    %376 = arith.maximumf %374, %375 : vector<8x256xf32>
    %377 = arith.addf %8, %370 : vector<8x256xf32>
    %cst_240 = arith.constant 0.000000e+00 : f32
    %378 = vector.broadcast %cst_240 : f32 to vector<8x256xf32>
    %379 = arith.maximumf %377, %378 : vector<8x256xf32>
    %c0_241 = arith.constant 0 : index
    %c0_242 = arith.constant 0 : index
    %c0_243 = arith.constant 0 : index
    %380 = vector.load %arg7[%c0_241, %c0_242, %c0_243] : memref<2x8x256xf32, #tpu.memory_space<vmem>>, vector<1x8x256xf32>
    %381 = vector.shape_cast %380 : vector<1x8x256xf32> to vector<8x256xf32>
    %382 = vector.shape_cast %379 : vector<8x256xf32> to vector<1x8x256xf32>
    tpu.vector_store %arg7[%c0_241, %c0_242, %c0_243], %382 {strides = array<i32>} : memref<2x8x256xf32, #tpu.memory_space<vmem>>, vector<1x8x256xf32>,
    %383 = arith.addf %10, %376 : vector<8x256xf32>
    %cst_244 = arith.constant 0.000000e+00 : f32
    %384 = vector.broadcast %cst_244 : f32 to vector<8x256xf32>
    %385 = arith.maximumf %383, %384 : vector<8x256xf32>
    %c1_245 = arith.constant 1 : index
    %c0_246 = arith.constant 0 : index
    %c0_247 = arith.constant 0 : index
    %386 = vector.load %arg7[%c1_245, %c0_246, %c0_247] : memref<2x8x256xf32, #tpu.memory_space<vmem>>, vector<1x8x256xf32>
    %387 = vector.shape_cast %386 : vector<1x8x256xf32> to vector<8x256xf32>
    %388 = vector.shape_cast %385 : vector<8x256xf32> to vector<1x8x256xf32>
    tpu.vector_store %arg7[%c1_245, %c0_246, %c0_247], %388 {strides = array<i32>} : memref<2x8x256xf32, #tpu.memory_space<vmem>>, vector<1x8x256xf32>,
    return
  }
}

</mosaic_0001>

<bundles_post_ra>
// kernel: identity_block_di_forward.1
= control target key start
LH: loop header
LB: loop body
LE: loop exit
PB: predicated region body
PF: predicated region fallthrough
CT: control target
= control target key end

     0   :  { %v3344_v0 = vmov 0.0   ;;  %s3345_s24 = smov 48   ;;  %s3346_s29 = smov 51   ;;  %v26_v5 = vlaneseq  ;;  %vm83_vm0 = vcmask 392192   ;;  %vm88_vm1 = vcmask 64512   ;;  %s4056_s0 = inlined_call_operand.vmem [shape: f32[2,8,256], index: 0, kind: input, shape index: {}]   ;;  %s4057_s1 = inlined_call_operand.vmem [shape: f32[3,3,8,8], index: 1, kind: input, shape index: {}]   ;;  %s4058_s2 = inlined_call_operand.vmem [shape: f32[8,1], index: 2, kind: input, shape index: {}]   ;;  %s4059_s3 = inlined_call_operand.vmem [shape: f32[8,1], index: 3, kind: input, shape index: {}]   ;;  %s4060_s4 = inlined_call_operand.vmem [shape: f32[3,3,8,8], index: 4, kind: input, shape index: {}]   ;;  %s4061_s5 = inlined_call_operand.vmem [shape: f32[8,1], index: 5, kind: input, shape index: {}]   ;;  %s4062_s6 = inlined_call_operand.vmem [shape: f32[8,1], index: 6, kind: input, shape index: {}]   ;;  %s4063_s7 = inlined_call_operand.vmem [shape: f32[2,8,256], index: 7, kind: output, shape index: {}]  }
   0x1   :  { %77 = vrot.lane.b32.xlu1 %v3344_v0, %s3345_s24  ;;  %v3399_v1 = vld [vmem:[%s4056_s0] sm:$0xff]  ;;  %156 = vmatprep.mubr.f32.mxu0 %v3344_v0  ;;  %v3408_v2 = vld [vmem:[%s4056_s0 + $0x8] sm:$0xff]  ;;  %s3347_s30 = smov 45   ;;  %s3348_s8 = smov 3   ;;  %v3457_v3 = vld [vmem:[%s4056_s0 + $0x18] sm:$0xff]  ;;  %vm67_vm2 = vcmask 416768  }
   0x2   :  { %79 = vrot.lane.b32.xlu0 %v3399_v1, %s3345_s24  ;;  %230 = vmatprep.mubr.f32.mxu1 %v3344_v0  ;;  %s3349_s9 = smov 125   ;;  %s3350_s10 = smov 83   ;;  %v3462_v4 = vld [vmem:[%s4056_s0 + $0x10] sm:$0xff]  ;;  %v27_v6 = vand.u32 127, %v26_v5  ;;  %v3502_v15 = vld [vmem:[%s4057_s1 + $0x8] sm:$0xff]  ;;  %v3522_v22 = vld [vmem:[%s4057_s1] sm:$0xff] }
   0x3   :  { %s3351_s11 = smov 80   ;;  %s3352_s12 = smov 77   ;;  %vm247_vm5 = vcmask 367616   ;;  %v3550_v31 = vld [vmem:[%s4057_s1 + $0x10] sm:$0xff]  ;;  %vm338_vm8 = vcmask 23552   ;;  %v3566_v35 = vld [vmem:[%s4057_s1 + $0x20] sm:$0xff] }
   0x4   :  { %v28_v8 = vadd.s32 128, %v27_v6  ;;  %v33_v13 = vand.u32 15, %v27_v6  ;;  %v3572_v37 = vld [vmem:[%s4057_s1 + $0x18] sm:$0xff]  ;;  %vm507_vm9 = vcmask 1022976   ;;  %v3595_v44 = vld [vmem:[%s4057_s1 + $0x28] sm:$0xff]  ;;  %vm598_vm10 = vcmask 678912  }
   0x5   :  { %63 = vrot.lane.b32.xlu1 %v3399_v1, %s3346_s29  ;;  %v3610_v49 = vld [vmem:[%s4057_s1 + $0x30] sm:$0xff]  ;;  %vm691_vm11 = vcmask 654336   ;;  %v3627_v56 = vld [vmem:[%s4057_s1 + $0x38] sm:$0xff]  ;;  %vm778_vm12 = vcmask 629760   ;;  %v3640_v61 = vld [vmem:[%s4057_s1 + $0x40] sm:$0xff] }
   0x6   :  { %81 = vrot.lane.b32.xlu0 %v3408_v2, %s3345_s24  ;;  %v40_v11 = vand.u32 15, %v28_v8  ;;  %vm3512_vm4 = vcmp.ge.s32.totalorder %v33_v13, 3  ;;  %vm3541_vm7 = vcmp.lt.s32.totalorder %v33_v13, 13 }
   0x8   :  { %vm3508_vm3 = vcmp.ge.s32.totalorder %v40_v11, 3  ;;  %vm3531_vm6 = vcmp.lt.s32.totalorder %v40_v11, 13 }
   0x9   :  { %61 = vrot.lane.b32.xlu1 %v3344_v0, %s3346_s29 }
   0xa   :  { %65 = vrot.lane.b32.xlu0 %v3408_v2, %s3346_s29 }
   0xd   :  { %245 = vrot.lane.b32.xlu1 %v3408_v2, %s3347_s30 }
   0xe   :  { %243 = vrot.lane.b32.xlu0 %v3399_v1, %s3347_s30 }
  0x11   :  { %334 = vrot.lane.b32.xlu1 %v3399_v1, %s3348_s8 }
  0x12   :  { %241 = vrot.lane.b32.xlu0 %v3344_v0, %s3347_s30 }
  0x15   :  { %332 = vrot.lane.b32.xlu1 %v3344_v0, %s3348_s8 }
  0x16   :  { %336 = vrot.lane.b32.xlu0 %v3408_v2, %s3348_s8 }
  0x19   :  { %505 = vrot.lane.b32.xlu1 %v3344_v0, %s3349_s9 }
  0x1a   :  { %503 = vrot.lane.b32.xlu0 %v3408_v2, %s3349_s9 }
  0x1d   :  { %594 = vrot.lane.b32.xlu1 %v3408_v2, %s3350_s10 }
  0x1e   :  { %501 = vrot.lane.b32.xlu0 %v3399_v1, %s3349_s9 }
  0x21   :  { %592 = vrot.lane.b32.xlu1 %v3399_v1, %s3350_s10 }
  0x22   :  { %596 = vrot.lane.b32.xlu0 %v3344_v0, %s3350_s10 }
  0x25   :  { %689 = vrot.lane.b32.xlu1 %v3344_v0, %s3351_s11 }
  0x26   :  { %687 = vrot.lane.b32.xlu0 %v3408_v2, %s3351_s11 }
  0x29   :  { %774 = vrot.lane.b32.xlu1 %v3408_v2, %s3352_s12 }
  0x2a   :  { %685 = vrot.lane.b32.xlu0 %v3399_v1, %s3351_s11 }
  0x2d   :  { %772 = vrot.lane.b32.xlu1 %v3399_v1, %s3352_s12 }
  0x2e   :  { %776 = vrot.lane.b32.xlu0 %v3344_v0, %s3352_s12 }
  0x31   :  { %877 = vrot.lane.b32.xlu1 %v3457_v3, %s3345_s24 }
  0x32   :  { %875 = vrot.lane.b32.xlu0 %v3462_v4, %s3345_s24 }
  0x35   :  { %867 = vrot.lane.b32.xlu1 %v3457_v3, %s3346_s29 }
  0x36   :  { %865 = vrot.lane.b32.xlu0 %v3462_v4, %s3346_s29 }
  0x39   :  { %1027 = vrot.lane.b32.xlu1 %v3457_v3, %s3347_s30 }
  0x3a   :  { %1025 = vrot.lane.b32.xlu0 %v3462_v4, %s3347_s30 }
  0x3d   :  { %1110 = vrot.lane.b32.xlu1 %v3457_v3, %s3348_s8 }
  0x3e   :  { %1108 = vrot.lane.b32.xlu0 %v3462_v4, %s3348_s8 }
  0x41   :  { %1264 = vrot.lane.b32.xlu1 %v3462_v4, %s3349_s9 }
  0x42   :  { %1266 = vrot.lane.b32.xlu0 %v3457_v3, %s3349_s9 }
  0x45   :  { %1347 = vrot.lane.b32.xlu1 %v3462_v4, %s3350_s10 }
  0x46   :  { %1349 = vrot.lane.b32.xlu0 %v3457_v3, %s3350_s10 }
  0x49   :  { %1430 = vrot.lane.b32.xlu1 %v3462_v4, %s3351_s11 }
  0x4a   :  { %1432 = vrot.lane.b32.xlu0 %v3457_v3, %s3351_s11 }
  0x4d   :  { %1511 = vrot.lane.b32.xlu1 %v3462_v4, %s3352_s12 }
  0x4e   :  { %1513 = vrot.lane.b32.xlu0 %v3457_v3, %s3352_s12 }
  0x73   :  { %v3496_v7 = vpop.permute.xlu1 %77 }
  0x74   :  { %v80_v9 = vpop.permute.xlu0 %79 }
  0x75   :  { %v84_v16 = vsel %vm83_vm0, %v3496_v7, %v80_v9 }
  0x77   :  { %v64_v10 = vpop.permute.xlu1 %63 }
  0x78   :  { %v82_v12 = vpop.permute.xlu0 %81 }
  0x79   :  { %v85_v14 = vsel %vm83_vm0, %v80_v9, %v82_v12 }
  0x7a   :  { %122 = vmatprep.subr.mxu0 %v85_v14 }
  0x7b   :  { %v3506_v17 = vpop.permute.xlu1 %61  ;;  %123 = vmatpush1.msra.mxu0 %v84_v16 }
  0x7c   :  { %v66_v19 = vpop.permute.xlu0 %65  ;;  %3223 = vmatmul.mubr.msk.f32.vlgmr.msra.gmra.mxu0 %vm88_vm1, %v3502_v15  ;;  %v68_v23 = vsel %vm67_vm2, %v3506_v17, %v64_v10 }
  0x7d   :  { %v69_v21 = vsel %vm67_vm2, %v64_v10, %v66_v19  ;;  %323 = vmatprep.mubr.f32.mxu0 %v3344_v0 }
  0x7e   :  { %3224 = vmatprep.subr.msk.mxu1 %vm3508_vm3, %v69_v21 }
  0x7f   :  { %v246_v24 = vpop.permute.xlu1 %245  ;;  %3225 = vmatpush1.msk.msra.mxu1 %vm3512_vm4, %v68_v23 }
  0x80   :  { %v244_v26 = vpop.permute.xlu0 %243  ;;  %3226 = vmatmul.mubr.msk.f32.vlgmr.msra.gmra.mxu1 %vm88_vm1, %v3522_v22 }
  0x81   :  { %v249_v27 = vsel %vm247_vm5, %v244_v26, %v246_v24  ;;  %414 = vmatprep.mubr.f32.mxu1 %v3344_v0 }
  0x82   :  { %3228 = vmatprep.subr.msk.mxu0 %vm3531_vm6, %v249_v27 }
  0x83   :  { %v335_v28 = vpop.permute.xlu1 %334 }
  0x84   :  { %v3545_v30 = vpop.permute.xlu0 %241 }
  0x85   :  { %v248_v32 = vsel %vm247_vm5, %v3545_v30, %v244_v26 }
  0x86   :  { %3229 = vmatpush1.msk.msra.mxu0 %vm3541_vm7, %v248_v32 }
  0x87   :  { %v3556_v33 = vpop.permute.xlu1 %332  ;;  %3230 = vmatmul.mubr.msk.f32.vlgmr.msra.gmra.mxu0 %vm88_vm1, %v3550_v31  ;;  %458 = vmatprep.subr.mxu0 %v3408_v2 }
  0x88   :  { %v337_v34 = vpop.permute.xlu0 %336  ;;  %459 = vmatpush1.msra.mxu0 %v3399_v1  ;;  %492 = vmatprep.mubr.f32.mxu0 %v3344_v0  ;;  %v339_v38 = vsel %vm338_vm8, %v3556_v33, %v335_v28 }
  0x89   :  { %v340_v36 = vsel %vm338_vm8, %v335_v28, %v337_v34 }
  0x8a   :  { %3232 = vmatprep.subr.msk.mxu1 %vm3508_vm3, %v340_v36 }
  0x8b   :  { %v3578_v39 = vpop.permute.xlu1 %505  ;;  %3233 = vmatpush1.msk.msra.mxu1 %vm3512_vm4, %v339_v38  ;;  %3236 = vmatmul.mubr.msk.f32.vlgmr.msra.gmra.mxu0 %vm88_vm1, %v3566_v35 }
  0x8c   :  { %v504_v40 = vpop.permute.xlu0 %503  ;;  %3234 = vmatmul.mubr.msk.f32.vlgmr.msra.gmra.mxu1 %vm88_vm1, %v3572_v37  ;;  %674 = vmatprep.mubr.f32.mxu0 %v3344_v0 }
  0x8d   :  { %v509_v41 = vsel %vm507_vm9, %v504_v40, %v3578_v39  ;;  %583 = vmatprep.mubr.f32.mxu1 %v3344_v0 }
  0x8e   :  { %3238 = vmatprep.subr.msk.mxu1 %vm3531_vm6, %v509_v41 }
  0x8f   :  { %v595_v42 = vpop.permute.xlu1 %594 }
  0x90   :  { %v502_v43 = vpop.permute.xlu0 %501 }
  0x91   :  { %v508_v45 = vsel %vm507_vm9, %v502_v43, %v504_v40 }
  0x92   :  { %3239 = vmatpush1.msk.msra.mxu1 %vm3541_vm7, %v508_v45 }
  0x93   :  { %v593_v46 = vpop.permute.xlu1 %592  ;;  %3240 = vmatmul.mubr.msk.f32.vlgmr.msra.gmra.mxu1 %vm88_vm1, %v3595_v44 }
  0x94   :  { %v3602_v47 = vpop.permute.xlu0 %596  ;;  %763 = vmatprep.mubr.f32.mxu1 %v3344_v0  ;;  %v599_v50 = vsel %vm598_vm10, %v593_v46, %v595_v42 }
  0x95   :  { %v600_v48 = vsel %vm598_vm10, %v595_v42, %v3602_v47 }
  0x96   :  { %3242 = vmatprep.subr.msk.mxu0 %vm3508_vm3, %v600_v48 }
  0x97   :  { %v3615_v51 = vpop.permute.xlu1 %689  ;;  %3243 = vmatpush1.msk.msra.mxu0 %vm3512_vm4, %v599_v50 }
  0x98   :  { %v688_v52 = vpop.permute.xlu0 %687  ;;  %3244 = vmatmul.mubr.msk.f32.vlgmr.msra.gmra.mxu0 %vm88_vm1, %v3610_v49 }
  0x99   :  { %v693_v53 = vsel %vm691_vm11, %v688_v52, %v3615_v51  ;;  %854 = vmatprep.mubr.f32.mxu0 %v3344_v0 }
  0x9a   :  { %729 = vmatprep.subr.mxu1 %v693_v53 }
  0x9b   :  { %v775_v54 = vpop.permute.xlu1 %774 }
  0x9c   :  { %v686_v55 = vpop.permute.xlu0 %685 }
  0x9d   :  { %v692_v57 = vsel %vm691_vm11, %v686_v55, %v688_v52 }
  0x9e   :  { %730 = vmatpush1.msra.mxu1 %v692_v57 }
  0x9f   :  { %v773_v58 = vpop.permute.xlu1 %772  ;;  %3246 = vmatmul.mubr.msk.f32.vlgmr.msra.gmra.mxu1 %vm88_vm1, %v3627_v56 }
  0xa0   :  { %v3632_v59 = vpop.permute.xlu0 %776  ;;  %947 = vmatprep.mubr.f32.mxu1 %v3344_v0  ;;  %v779_v62 = vsel %vm778_vm12, %v773_v58, %v775_v54 }
  0xa1   :  { %v780_v60 = vsel %vm778_vm12, %v775_v54, %v3632_v59 }
  0xa2   :  { %3248 = vmatprep.subr.msk.mxu0 %vm3531_vm6, %v780_v60 }
  0xa3   :  { %3249 = vmatpush1.msk.msra.mxu0 %vm3541_vm7, %v779_v62  ;;  %v878_v63 = vpop.permute.xlu1 %877 }
  0xa4   :  { %v876_v1 = vpop.permute.xlu0 %875  ;;  %3250 = vmatmul.mubr.msk.f32.vlgmr.msra.gmra.mxu0 %vm88_vm1, %v3640_v61 }
  0xa5   :  { %v879_v2 = vsel %vm83_vm0, %v3496_v7, %v876_v1  ;;  %v880_v5 = vsel %vm83_vm0, %v876_v1, %v878_v63  ;;  %1018 = vmatprep.mubr.f32.mxu0 %v3344_v0 }
  0xa6   :  { %913 = vmatprep.subr.mxu1 %v880_v5 }
  0xa7   :  { %914 = vmatpush1.msra.mxu1 %v879_v2  ;;  %v868_v6 = vpop.permute.xlu1 %867 }
  0xa8   :  { %v866_v8 = vpop.permute.xlu0 %865  ;;  %3251 = vmatmul.mubr.msk.f32.vlgmr.msra.gmra.mxu1 %vm88_vm1, %v3502_v15 }
  0xa9   :  { %v869_v9 = vsel %vm67_vm2, %v3506_v17, %v866_v8  ;;  %v870_v10 = vsel %vm67_vm2, %v866_v8, %v868_v6  ;;  %1099 = vmatprep.mubr.f32.mxu1 %v3344_v0 }
  0xaa   :  { %3252 = vmatprep.subr.msk.mxu0 %vm3508_vm3, %v870_v10 }
  0xab   :  { %3253 = vmatpush1.msk.msra.mxu0 %vm3512_vm4, %v869_v9  ;;  %v1028_v11 = vpop.permute.xlu1 %1027 }
  0xac   :  { %v1026_v12 = vpop.permute.xlu0 %1025  ;;  %3254 = vmatmul.mubr.msk.f32.vlgmr.msra.gmra.mxu0 %vm88_vm1, %v3522_v22 }
  0xad   :  { %v1029_v13 = vsel %vm247_vm5, %v3545_v30, %v1026_v12  ;;  %v1030_v14 = vsel %vm247_vm5, %v1026_v12, %v1028_v11  ;;  %1182 = vmatprep.mubr.f32.mxu0 %v3344_v0 }
  0xae   :  { %3255 = vmatprep.subr.msk.mxu1 %vm3531_vm6, %v1030_v14 }
  0xaf   :  { %3256 = vmatpush1.msk.msra.mxu1 %vm3541_vm7, %v1029_v13  ;;  %v1111_v15 = vpop.permute.xlu1 %1110 }
  0xb0   :  { %v1109_v16 = vpop.permute.xlu0 %1108  ;;  %3257 = vmatmul.mubr.msk.f32.vlgmr.msra.gmra.mxu1 %vm88_vm1, %v3550_v31  ;;  %1221 = vmatprep.subr.mxu1 %v3457_v3 }
  0xb1   :  { %v1112_v19 = vsel %vm338_vm8, %v3556_v33, %v1109_v16  ;;  %v1113_v21 = vsel %vm338_vm8, %v1109_v16, %v1111_v15  ;;  %1222 = vmatpush1.msra.mxu1 %v3462_v4  ;;  %1255 = vmatprep.mubr.f32.mxu1 %v3344_v0 }
  0xb2   :  { %3258 = vmatprep.subr.msk.mxu0 %vm3508_vm3, %v1113_v21 }
  0xb3   :  { %3259 = vmatpush1.msk.msra.mxu0 %vm3512_vm4, %v1112_v19  ;;  %v1265_v22 = vpop.permute.xlu1 %1264 }
  0xb4   :  { %v1267_v23 = vpop.permute.xlu0 %1266  ;;  %3260 = vmatmul.mubr.msk.f32.vlgmr.msra.gmra.mxu0 %vm88_vm1, %v3572_v37  ;;  %3261 = vmatmul.mubr.msk.f32.vlgmr.msra.gmra.mxu1 %vm88_vm1, %v3566_v35 }
  0xb5   :  { %v1268_v3 = vsel %vm507_vm9, %v1265_v22, %v1267_v23  ;;  %v1269_v4 = vsel %vm507_vm9, %v1267_v23, %v3578_v39  ;;  %1338 = vmatprep.mubr.f32.mxu0 %v3344_v0  ;;  %1421 = vmatprep.mubr.f32.mxu1 %v3344_v0 }
  0xb6   :  { %3262 = vmatprep.subr.msk.mxu0 %vm3531_vm6, %v1269_v4 }
  0xb7   :  { %3263 = vmatpush1.msk.msra.mxu0 %vm3541_vm7, %v1268_v3  ;;  %v1348_v24 = vpop.permute.xlu1 %1347 }
  0xb8   :  { %v1350_v26 = vpop.permute.xlu0 %1349  ;;  %3264 = vmatmul.mubr.msk.f32.vlgmr.msra.gmra.mxu0 %vm88_vm1, %v3595_v44 }
  0xb9   :  { %v1351_v27 = vsel %vm598_vm10, %v1348_v24, %v1350_v26  ;;  %v1352_v28 = vsel %vm598_vm10, %v1350_v26, %v3602_v47  ;;  %1502 = vmatprep.mubr.f32.mxu0 %v3344_v0 }
  0xba   :  { %3265 = vmatprep.subr.msk.mxu1 %vm3508_vm3, %v1352_v28 }
  0xbb   :  { %3266 = vmatpush1.msk.msra.mxu1 %vm3512_vm4, %v1351_v27  ;;  %v1431_v31 = vpop.permute.xlu1 %1430 }
  0xbc   :  { %3267 = vmatmul.mubr.msk.f32.vlgmr.msra.gmra.mxu1 %vm88_vm1, %v3610_v49  ;;  %v1433_v32 = vpop.permute.xlu0 %1432 }
  0xbd   :  { %v1434_v34 = vsel %vm691_vm11, %v1431_v31, %v1433_v32  ;;  %v1435_v35 = vsel %vm691_vm11, %v1433_v32, %v3615_v51  ;;  %1585 = vmatprep.mubr.f32.mxu1 %v3344_v0 }
  0xbe   :  { %1468 = vmatprep.subr.mxu0 %v1435_v35 }
  0xbf   :  { %1469 = vmatpush1.msra.mxu0 %v1434_v34  ;;  %v1512_v36 = vpop.permute.xlu1 %1511 }
  0xc0   :  { %3268 = vmatmul.mubr.msk.f32.vlgmr.msra.gmra.mxu0 %vm88_vm1, %v3627_v56  ;;  %v1514_v37 = vpop.permute.xlu0 %1513 }
  0xc1   :  { %v1515_v38 = vsel %vm778_vm12, %v1512_v36, %v1514_v37  ;;  %v1516_v40 = vsel %vm778_vm12, %v1514_v37, %v3632_v59  ;;  %1737 = vmatprep.mubr.f32.mxu0 %v3344_v0 }
  0xc2   :  { %3269 = vmatprep.subr.msk.mxu1 %vm3531_vm6, %v1516_v40 }
  0xc3   :  { %3270 = vmatpush1.msk.msra.mxu1 %vm3541_vm7, %v1515_v38 }
  0xc4   :  { %3271 = vmatmul.mubr.msk.f32.vlgmr.msra.gmra.mxu1 %vm88_vm1, %v3640_v61 }
  0xc5   :  { %1811 = vmatprep.mubr.f32.mxu1 %v3344_v0 }
 0x13c   :  { %v158_v41 = vpop.f32.mrf.mxu0 }
 0x13e   :  { %v160_v42 = vpop.f32.mrf.mxu0 }
 0x140   :  { %v232_v43 = vpop.f32.mrf.mxu1 }
 0x141   :  { %v233_v46 = vadd.f32 %v232_v43, %v158_v41 }
 0x142   :  { %v234_v44 = vpop.f32.mrf.mxu1 }
 0x143   :  { %v235_v48 = vadd.f32 %v234_v44, %v160_v42 }
 0x147   :  { %v325_v45 = vpop.f32.mrf.mxu0 }
 0x148   :  { %v330_v52 = vadd.f32 %v325_v45, %v233_v46 }
 0x149   :  { %v327_v49 = vpop.f32.mrf.mxu0 }
 0x14a   :  { %v331_v53 = vadd.f32 %v327_v49, %v235_v48 }
 0x14b   :  { %v494_v55 = vpop.f32.mrf.mxu0 }
 0x14c   :  { %v416_v50 = vpop.f32.mrf.mxu1 }
 0x14d   :  { %v421_v56 = vadd.f32 %v416_v50, %v330_v52  ;;  %v496_v58 = vpop.f32.mrf.mxu0 }
 0x14e   :  { %v418_v54 = vpop.f32.mrf.mxu1 }
 0x14f   :  { %v422_v57 = vadd.f32 %v418_v54, %v331_v53  ;;  %v499_v61 = vadd.f32 %v494_v55, %v421_v56 }
 0x151   :  { %v500_v62 = vadd.f32 %v496_v58, %v422_v57 }
 0x153   :  { %v585_v60 = vpop.f32.mrf.mxu1 }
 0x154   :  { %v590_v2 = vadd.f32 %v585_v60, %v499_v61 }
 0x155   :  { %v587_v63 = vpop.f32.mrf.mxu1 }
 0x156   :  { %v591_v5 = vadd.f32 %v587_v63, %v500_v62 }
 0x158   :  { %v676_v1 = vpop.f32.mrf.mxu0 }
 0x159   :  { %v681_v8 = vadd.f32 %v676_v1, %v590_v2 }
 0x15a   :  { %v678_v6 = vpop.f32.mrf.mxu0 }
 0x15b   :  { %v682_v9 = vadd.f32 %v678_v6, %v591_v5 }
 0x15f   :  { %v765_v10 = vpop.f32.mrf.mxu1 }
 0x160   :  { %v770_v11 = vadd.f32 %v765_v10, %v681_v8 }
 0x161   :  { %v767_v12 = vpop.f32.mrf.mxu1 }
 0x162   :  { %v771_v13 = vadd.f32 %v767_v12, %v682_v9  ;;  %v3353_v9 = vmov 0  }
 0x163   :  { %3334 = vset.pattern.permute.xlu1 %v3353_v9  ;;  %3335 = vset.pattern.permute.xlu0 %v3353_v9 }
 0x164   :  { %v856_v14 = vpop.f32.mrf.mxu0 }
 0x165   :  { %v3727_v15 = vadd.f32 %v856_v14, %v770_v11 }
 0x166   :  { %v858_v16 = vpop.f32.mrf.mxu0 }
 0x167   :  { %v3729_v19 = vadd.f32 %v858_v16, %v771_v13  ;;  %v1597_v21 = vmul.f32 %v3727_v15, %v3727_v15 }
 0x168   :  { %v949_v22 = vpop.f32.mrf.mxu1 }
 0x169   :  { %v1594_v23 = vadd.f32 %v3729_v19, %v3727_v15  ;;  %v1598_v3 = vmul.f32 %v3729_v19, %v3729_v19 }
 0x16a   :  { %v951_v24 = vpop.f32.mrf.mxu1 }
 0x16b   :  { %1595 = vadd.xlane.f32.xlu0 %v1594_v23  ;;  %v1599_v4 = vadd.f32 %v1598_v3, %v1597_v21 }
 0x16c   :  { %v1020_v26 = vpop.f32.mrf.mxu0 }
 0x16d   :  { %v1021_v27 = vadd.f32 %v1020_v26, %v949_v22  ;;  %v52_v26 = vld [vmem:[%s4058_s2] sm:$0xff] }
 0x16e   :  { %v1022_v28 = vpop.f32.mrf.mxu0 }
 0x16f   :  { %v1023_v31 = vadd.f32 %v1022_v28, %v951_v24  ;;  %1600 = vadd.xlane.f32.xlu0 %v1599_v4 }
 0x170   :  { %v1101_v32 = vpop.f32.mrf.mxu1 }
 0x171   :  { %v1106_v34 = vadd.f32 %v1101_v32, %v1021_v27 }
 0x172   :  { %v1103_v35 = vpop.f32.mrf.mxu1 }
 0x173   :  { %v1107_v36 = vadd.f32 %v1103_v35, %v1023_v31  ;;  %v53_v31 = vld [vmem:[%s4059_s3] sm:$0xff] }
 0x174   :  { %v1184_v37 = vpop.f32.mrf.mxu0  ;;  %v1257_v38 = vpop.f32.mrf.mxu1 }
 0x175   :  { %v1189_v40 = vadd.f32 %v1184_v37, %v1106_v34 }
 0x176   :  { %v1186_v41 = vpop.f32.mrf.mxu0  ;;  %v1259_v44 = vpop.f32.mrf.mxu1 }
 0x177   :  { %v1190_v42 = vadd.f32 %v1186_v41, %v1107_v36  ;;  %v1262_v43 = vadd.f32 %v1257_v38, %v1189_v40 }
 0x178   :  { %v1340_v45 = vpop.f32.mrf.mxu0 }
 0x179   :  { %v1263_v46 = vadd.f32 %v1259_v44, %v1190_v42  ;;  %v1345_v48 = vadd.f32 %v1340_v45, %v1262_v43 }
 0x17a   :  { %v1342_v49 = vpop.f32.mrf.mxu0 }
 0x17b   :  { %v1346_v52 = vadd.f32 %v1342_v49, %v1263_v46 }
 0x17c   :  { %v1423_v50 = vpop.f32.mrf.mxu1 }
 0x17d   :  { %v1428_v53 = vadd.f32 %v1423_v50, %v1345_v48 }
 0x17e   :  { %v1425_v54 = vpop.f32.mrf.mxu1 }
 0x17f   :  { %v1429_v57 = vadd.f32 %v1425_v54, %v1346_v52  ;;  %v3821_v54 = vld [vmem:[%s4060_s4 + $0x8] sm:$0xff] }
 0x180   :  { %v1504_v55 = vpop.f32.mrf.mxu0 }
 0x181   :  { %v1509_v58 = vadd.f32 %v1504_v55, %v1428_v53 }
 0x182   :  { %v1506_v56 = vpop.f32.mrf.mxu0 }
 0x183   :  { %v1510_v61 = vadd.f32 %v1506_v56, %v1429_v57 }
 0x184   :  { %v1587_v60 = vpop.f32.mrf.mxu1 }
 0x185   :  { %v1592_v62 = vadd.f32 %v1587_v60, %v1509_v58 }
 0x186   :  { %v1589_v63 = vpop.f32.mrf.mxu1 }
 0x187   :  { %v1593_v1 = vadd.f32 %v1589_v63, %v1510_v61  ;;  %v1606_v5 = vmul.f32 %v1592_v62, %v1592_v62 }
 0x189   :  { %v1602_v2 = vadd.f32 %v1593_v1, %v1592_v62  ;;  %v1607_v6 = vmul.f32 %v1593_v1, %v1593_v1 }
 0x18b   :  { %1603 = vadd.xlane.f32.xlu1 %v1602_v2  ;;  %v1608_v8 = vadd.f32 %v1607_v6, %v1606_v5 }
 0x18d   :  { %1609 = vadd.xlane.f32.xlu0 %v1608_v8  ;;  %v3847_v8 = vld [vmem:[%s4060_s4 + $0x10] sm:$0xff] }
 0x1f4   :  { %v1596_v10 = vpop.xlane.xlu0 %1595 }
 0x1f8   :  { %v1601_v11 = vpop.xlane.xlu0 %1600 }
 0x214   :  { %v1604_v12 = vpop.xlane.xlu1 %1603 }
 0x215   :  { %v1605_v13 = vadd.f32 %v1604_v12, %v1596_v10 }
 0x216   :  { %v1610_v14 = vpop.xlane.xlu0 %1609 }
 0x217   :  { %v1613_v16 = vmul.f32 0.001953125, %v1605_v13  ;;  %v1611_v21 = vadd.f32 %v1610_v14, %v1601_v11  ;;  %v3865_v13 = vld [vmem:[%s4060_s4 + $0x20] sm:$0xff] }
 0x219   :  { %v1615_v22 = vmul.f32 %v1613_v16, %v1613_v16  ;;  %v1614_v23 = vmul.f32 0.001953125, %v1611_v21  ;;  %v3875_v21 = vld [vmem:[%s4060_s4 + $0x18] sm:$0xff] }
 0x21b   :  { %v1616_v3 = vsub.f32 %v1614_v23, %v1615_v22 }
 0x21d   :  { %v1617_v4 = vmax.f32 %v1616_v3, 0.0 }
 0x21f   :  { %v1618_v24 = vadd.f32 1e-05, %v1617_v4 }
 0x221   :  { %3336 = vrsqrt.f32 %v1618_v24 }
 0x22e   :  { %v3337_v27 = vpop.eup %3336 }
 0x22f   :  { %v1620_v28 = vmul.f32 %v3337_v27, %v52_v26  ;;  %v3895_v26 = vld [vmem:[%s4060_s4 + $0x28] sm:$0xff] }
 0x231   :  { %1625 = vperm.xlu1 %3334, %v1620_v28   ;;  %v1621_v32 = vmul.f32 %v1620_v28, %v1613_v16 }
 0x233   :  { %v1622_v34 = vsub.f32 %v53_v31, %v1621_v32  ;;  %v3906_v31 = vld [vmem:[%s4060_s4 + $0x30] sm:$0xff] }
 0x235   :  { %1632 = vperm.xlu0 %3335, %v1622_v34  }
 0x2ac   :  { %v1626_v35 = vpop.permute.xlu1 %1625 }
 0x2ad   :  { %v1628_v36 = vmul.f32 %v1626_v35, %v3727_v15  ;;  %v1629_v37 = vmul.f32 %v1626_v35, %v3729_v19  ;;  %v1639_v15 = vmul.f32 %v1626_v35, %v1592_v62  ;;  %v1640_v45 = vmul.f32 %v1626_v35, %v1593_v1  ;;  %v3832_v62 = vld [vmem:[%s4060_s4] sm:$0xff] }
 0x2b0   :  { %v1633_v38 = vpop.permute.xlu0 %1632 }
 0x2b1   :  { %v1635_v40 = vadd.f32 %v1633_v38, %v1628_v36  ;;  %v1636_v41 = vadd.f32 %v1633_v38, %v1629_v37  ;;  %v1641_v19 = vadd.f32 %v1639_v15, %v1633_v38  ;;  %v1642_v46 = vadd.f32 %v1640_v45, %v1633_v38  ;;  %v3921_v37 = vld [vmem:[%s4060_s4 + $0x38] sm:$0xff] }
 0x2b3   :  { %v3745_v42 = vmax.f32 %v1635_v40, 0.0  ;;  %v3747_v43 = vmax.f32 %v1636_v41, 0.0  ;;  %v3765_v44 = vmax.f32 %v1641_v19, 0.0  ;;  %v3783_v48 = vmax.f32 %v1642_v46, 0.0 }
 0x2b5   :  { %2074 = vrot.lane.b32.xlu0 %v3747_v43, %s3349_s9  ;;  %1662 = vrot.lane.b32.xlu1 %v3745_v42, %s3345_s24 }
 0x2b9   :  { %2162 = vrot.lane.b32.xlu0 %v3747_v43, %s3350_s10  ;;  %1664 = vrot.lane.b32.xlu1 %v3747_v43, %s3345_s24 }
 0x2bd   :  { %2252 = vrot.lane.b32.xlu0 %v3747_v43, %s3351_s11  ;;  %1649 = vrot.lane.b32.xlu1 %v3745_v42, %s3346_s29 }
 0x2c1   :  { %2336 = vrot.lane.b32.xlu0 %v3747_v43, %s3352_s12  ;;  %1651 = vrot.lane.b32.xlu1 %v3747_v43, %s3346_s29 }
 0x2c5   :  { %1818 = vrot.lane.b32.xlu1 %v3745_v42, %s3347_s30  ;;  %2434 = vrot.lane.b32.xlu0 %v3765_v44, %s3345_s24 }
 0x2c9   :  { %1820 = vrot.lane.b32.xlu1 %v3747_v43, %s3347_s30  ;;  %2424 = vrot.lane.b32.xlu0 %v3765_v44, %s3346_s29 }
 0x2cd   :  { %1906 = vrot.lane.b32.xlu1 %v3745_v42, %s3348_s8  ;;  %2584 = vrot.lane.b32.xlu0 %v3765_v44, %s3347_s30 }
 0x2d1   :  { %1908 = vrot.lane.b32.xlu1 %v3747_v43, %s3348_s8  ;;  %2667 = vrot.lane.b32.xlu0 %v3765_v44, %s3348_s8 }
 0x2d5   :  { %2072 = vrot.lane.b32.xlu1 %v3745_v42, %s3349_s9  ;;  %2825 = vrot.lane.b32.xlu0 %v3783_v48, %s3349_s9 }
 0x2d9   :  { %2160 = vrot.lane.b32.xlu1 %v3745_v42, %s3350_s10  ;;  %2908 = vrot.lane.b32.xlu0 %v3783_v48, %s3350_s10 }
 0x2dd   :  { %2250 = vrot.lane.b32.xlu1 %v3745_v42, %s3351_s11  ;;  %2991 = vrot.lane.b32.xlu0 %v3783_v48, %s3351_s11 }
 0x2e1   :  { %2334 = vrot.lane.b32.xlu1 %v3745_v42, %s3352_s12  ;;  %3072 = vrot.lane.b32.xlu0 %v3783_v48, %s3352_s12 }
 0x2e5   :  { %2436 = vrot.lane.b32.xlu1 %v3783_v48, %s3345_s24 }
 0x2e9   :  { %2426 = vrot.lane.b32.xlu1 %v3783_v48, %s3346_s29 }
 0x2ed   :  { %2586 = vrot.lane.b32.xlu1 %v3783_v48, %s3347_s30 }
 0x2f1   :  { %2669 = vrot.lane.b32.xlu1 %v3783_v48, %s3348_s8 }
 0x2f5   :  { %2823 = vrot.lane.b32.xlu1 %v3765_v44, %s3349_s9 }
 0x2f9   :  { %2906 = vrot.lane.b32.xlu1 %v3765_v44, %s3350_s10 }
 0x2fd   :  { %2989 = vrot.lane.b32.xlu1 %v3765_v44, %s3351_s11 }
 0x301   :  { %3070 = vrot.lane.b32.xlu1 %v3765_v44, %s3352_s12 }
 0x327   :  { %v1663_v49 = vpop.permute.xlu1 %1662  ;;  %v2075_v50 = vpop.permute.xlu0 %2074 }
 0x328   :  { %v1666_v55 = vsel %vm83_vm0, %v3496_v7, %v1663_v49  ;;  %v2077_v23 = vsel %vm507_vm9, %v2075_v50, %v3578_v39 }
 0x32b   :  { %v1665_v52 = vpop.permute.xlu1 %1664  ;;  %v2163_v56 = vpop.permute.xlu0 %2162 }
 0x32c   :  { %v1667_v53 = vsel %vm83_vm0, %v1663_v49, %v1665_v52  ;;  %v2165_v11 = vsel %vm598_vm10, %v2163_v56, %v3602_v47 }
 0x32d   :  { %1703 = vmatprep.subr.mxu0 %v1667_v53 }
 0x32e   :  { %1704 = vmatpush1.msra.mxu0 %v1666_v55 }
 0x32f   :  { %v1650_v57 = vpop.permute.xlu1 %1649  ;;  %3273 = vmatmul.mubr.msk.f32.vlgmr.msra.gmra.mxu0 %vm88_vm1, %v3821_v54  ;;  %v2253_v60 = vpop.permute.xlu0 %2252 }
 0x330   :  { %1897 = vmatprep.mubr.f32.mxu0 %v3344_v0  ;;  %v1653_v63 = vsel %vm67_vm2, %v3506_v17, %v1650_v57  ;;  %v2255_v27 = vsel %vm691_vm11, %v2253_v60, %v3615_v51 }
 0x333   :  { %v1652_v58 = vpop.permute.xlu1 %1651  ;;  %v2337_v2 = vpop.permute.xlu0 %2336 }
 0x334   :  { %v1654_v61 = vsel %vm67_vm2, %v1650_v57, %v1652_v58  ;;  %v2339_v35 = vsel %vm778_vm12, %v2337_v2, %v3632_v59 }
 0x335   :  { %3274 = vmatprep.subr.msk.mxu1 %vm3508_vm3, %v1654_v61 }
 0x336   :  { %3275 = vmatpush1.msk.msra.mxu1 %vm3512_vm4, %v1653_v63 }
 0x337   :  { %v1819_v1 = vpop.permute.xlu1 %1818  ;;  %3276 = vmatmul.mubr.msk.f32.vlgmr.msra.gmra.mxu1 %vm88_vm1, %v3832_v62  ;;  %v2435_v12 = vpop.permute.xlu0 %2434 }
 0x338   :  { %1985 = vmatprep.mubr.f32.mxu1 %v3344_v0  ;;  %v1822_v9 = vsel %vm247_vm5, %v3545_v30, %v1819_v1  ;;  %v2438_v46 = vsel %vm83_vm0, %v3496_v7, %v2435_v12 }
 0x33b   :  { %v1821_v5 = vpop.permute.xlu1 %1820  ;;  %v2425_v3 = vpop.permute.xlu0 %2424 }
 0x33c   :  { %v1823_v6 = vsel %vm247_vm5, %v1819_v1, %v1821_v5  ;;  %v2428_v52 = vsel %vm67_vm2, %v3506_v17, %v2425_v3 }
 0x33d   :  { %3278 = vmatprep.subr.msk.mxu0 %vm3531_vm6, %v1823_v6 }
 0x33e   :  { %3279 = vmatpush1.msk.msra.mxu0 %vm3541_vm7, %v1822_v9 }
 0x33f   :  { %2029 = vmatprep.subr.mxu0 %v3747_v43  ;;  %v1907_v10 = vpop.permute.xlu1 %1906  ;;  %3280 = vmatmul.mubr.msk.f32.vlgmr.msra.gmra.mxu0 %vm88_vm1, %v3847_v8  ;;  %v2585_v32 = vpop.permute.xlu0 %2584 }
 0x340   :  { %2030 = vmatpush1.msra.mxu0 %v3745_v42  ;;  %2063 = vmatprep.mubr.f32.mxu0 %v3344_v0  ;;  %v1910_v22 = vsel %vm338_vm8, %v3556_v33, %v1907_v10  ;;  %v3930_v42 = vld [vmem:[%s4060_s4 + $0x40] sm:$0xff]  ;;  %v2588_v55 = vsel %vm247_vm5, %v3545_v30, %v2585_v32 }
 0x341   :  { %3292 = vmatprep.subr.msk.mxu0 %vm3508_vm3, %v2165_v11 }
 0x343   :  { %v1909_v14 = vpop.permute.xlu1 %1908  ;;  %3286 = vmatmul.mubr.msk.f32.vlgmr.msra.gmra.mxu0 %vm88_vm1, %v3865_v13  ;;  %v2668_v40 = vpop.permute.xlu0 %2667 }
 0x344   :  { %v1911_v16 = vsel %vm338_vm8, %v1907_v10, %v1909_v14  ;;  %2239 = vmatprep.mubr.f32.mxu0 %v3344_v0  ;;  %v2671_v30 = vsel %vm338_vm8, %v3556_v33, %v2668_v40 }
 0x345   :  { %3282 = vmatprep.subr.msk.mxu1 %vm3508_vm3, %v1911_v16 }
 0x346   :  { %3283 = vmatpush1.msk.msra.mxu1 %vm3512_vm4, %v1910_v22 }
 0x347   :  { %3288 = vmatprep.subr.msk.mxu1 %vm3531_vm6, %v2077_v23  ;;  %v2073_v4 = vpop.permute.xlu1 %2072  ;;  %3284 = vmatmul.mubr.msk.f32.vlgmr.msra.gmra.mxu1 %vm88_vm1, %v3875_v21  ;;  %v2826_v19 = vpop.permute.xlu0 %2825 }
 0x348   :  { %v2076_v24 = vsel %vm507_vm9, %v2073_v4, %v2075_v50  ;;  %2151 = vmatprep.mubr.f32.mxu1 %v3344_v0 }
 0x349   :  { %3289 = vmatpush1.msk.msra.mxu1 %vm3541_vm7, %v2076_v24 }
 0x34a   :  { %2291 = vmatprep.subr.mxu1 %v2255_v27 }
 0x34b   :  { %v2161_v28 = vpop.permute.xlu1 %2160  ;;  %3290 = vmatmul.mubr.msk.f32.vlgmr.msra.gmra.mxu1 %vm88_vm1, %v3895_v26  ;;  %v2909_v53 = vpop.permute.xlu0 %2908 }
 0x34c   :  { %v2164_v34 = vsel %vm598_vm10, %v2161_v28, %v2163_v56  ;;  %2325 = vmatprep.mubr.f32.mxu1 %v3344_v0  ;;  %v2911_v56 = vsel %vm598_vm10, %v2909_v53, %v3602_v47 }
 0x34d   :  { %3293 = vmatpush1.msk.msra.mxu0 %vm3512_vm4, %v2164_v34 }
 0x34e   :  { %3298 = vmatprep.subr.msk.mxu0 %vm3531_vm6, %v2339_v35  ;;  %3294 = vmatmul.mubr.msk.f32.vlgmr.msra.gmra.mxu0 %vm88_vm1, %v3906_v31 }
 0x34f   :  { %v2251_v36 = vpop.permute.xlu1 %2250  ;;  %2413 = vmatprep.mubr.f32.mxu0 %v3344_v0  ;;  %v2992_v57 = vpop.permute.xlu0 %2991 }
 0x350   :  { %v2254_v38 = vsel %vm691_vm11, %v2251_v36, %v2253_v60  ;;  %v2994_v18 = vsel %vm691_vm11, %v2992_v57, %v3615_v51 }
 0x351   :  { %2292 = vmatpush1.msra.mxu1 %v2254_v38 }
 0x352   :  { %3296 = vmatmul.mubr.msk.f32.vlgmr.msra.gmra.mxu1 %vm88_vm1, %v3921_v37 }
 0x353   :  { %v2335_v41 = vpop.permute.xlu1 %2334  ;;  %2506 = vmatprep.mubr.f32.mxu1 %v3344_v0 }
 0x354   :  { %v2338_v43 = vsel %vm778_vm12, %v2335_v41, %v2337_v2 }
 0x355   :  { %3299 = vmatpush1.msk.msra.mxu0 %vm3541_vm7, %v2338_v43 }
 0x356   :  { %3300 = vmatmul.mubr.msk.f32.vlgmr.msra.gmra.mxu0 %vm88_vm1, %v3930_v42 }
 0x357   :  { %v2437_v15 = vpop.permute.xlu1 %2436  ;;  %2577 = vmatprep.mubr.f32.mxu0 %v3344_v0 }
 0x358   :  { %v2439_v45 = vsel %vm83_vm0, %v2435_v12, %v2437_v15 }
 0x359   :  { %2472 = vmatprep.subr.mxu1 %v2439_v45 }
 0x35a   :  { %2473 = vmatpush1.msra.mxu1 %v2438_v46 }
 0x35b   :  { %v2427_v49 = vpop.permute.xlu1 %2426  ;;  %3301 = vmatmul.mubr.msk.f32.vlgmr.msra.gmra.mxu1 %vm88_vm1, %v3821_v54 }
 0x35c   :  { %v2429_v50 = vsel %vm67_vm2, %v2425_v3, %v2427_v49  ;;  %2658 = vmatprep.mubr.f32.mxu1 %v3344_v0 }
 0x35d   :  { %3302 = vmatprep.subr.msk.mxu0 %vm3508_vm3, %v2429_v50 }
 0x35e   :  { %3303 = vmatpush1.msk.msra.mxu0 %vm3512_vm4, %v2428_v52 }
 0x35f   :  { %v2587_v7 = vpop.permute.xlu1 %2586  ;;  %3304 = vmatmul.mubr.msk.f32.vlgmr.msra.gmra.mxu0 %vm88_vm1, %v3832_v62 }
 0x360   :  { %v2589_v54 = vsel %vm247_vm5, %v2585_v32, %v2587_v7  ;;  %2741 = vmatprep.mubr.f32.mxu0 %v3344_v0 }
 0x361   :  { %3305 = vmatprep.subr.msk.mxu1 %vm3531_vm6, %v2589_v54 }
 0x362   :  { %3306 = vmatpush1.msk.msra.mxu1 %vm3541_vm7, %v2588_v55 }
 0x363   :  { %v2670_v17 = vpop.permute.xlu1 %2669  ;;  %2780 = vmatprep.subr.mxu1 %v3783_v48  ;;  %3307 = vmatmul.mubr.msk.f32.vlgmr.msra.gmra.mxu1 %vm88_vm1, %v3847_v8  ;;  %v2828_v48 = vsel %vm507_vm9, %v2826_v19, %v3578_v39  ;;  %v3073_v39 = vpop.permute.xlu0 %3072 }
 0x364   :  { %v2672_v58 = vsel %vm338_vm8, %v2668_v40, %v2670_v17  ;;  %2781 = vmatpush1.msra.mxu1 %v3765_v44  ;;  %2814 = vmatprep.mubr.f32.mxu1 %v3344_v0  ;;  %v3075_v61 = vsel %vm778_vm12, %v3073_v39, %v3632_v59 }
 0x365   :  { %3308 = vmatprep.subr.msk.mxu0 %vm3508_vm3, %v2672_v58  ;;  %3315 = vmatprep.subr.msk.mxu1 %vm3508_vm3, %v2911_v56 }
 0x366   :  { %3309 = vmatpush1.msk.msra.mxu0 %vm3512_vm4, %v2671_v30 }
 0x367   :  { %v2824_v47 = vpop.permute.xlu1 %2823  ;;  %3312 = vmatprep.subr.msk.mxu0 %vm3531_vm6, %v2828_v48  ;;  %3310 = vmatmul.mubr.msk.f32.vlgmr.msra.gmra.mxu0 %vm88_vm1, %v3875_v21 }
 0x368   :  { %v2827_v33 = vsel %vm507_vm9, %v2824_v47, %v2826_v19  ;;  %3311 = vmatmul.mubr.msk.f32.vlgmr.msra.gmra.mxu1 %vm88_vm1, %v3865_v13  ;;  %2897 = vmatprep.mubr.f32.mxu0 %v3344_v0 }
 0x369   :  { %3313 = vmatpush1.msk.msra.mxu0 %vm3541_vm7, %v2827_v33  ;;  %2980 = vmatprep.mubr.f32.mxu1 %v3344_v0 }
 0x36a   :  { %3027 = vmatprep.subr.mxu0 %v2994_v18 }
 0x36b   :  { %v2907_v44 = vpop.permute.xlu1 %2906  ;;  %3314 = vmatmul.mubr.msk.f32.vlgmr.msra.gmra.mxu0 %vm88_vm1, %v3895_v26 }
 0x36c   :  { %v2910_v60 = vsel %vm598_vm10, %v2907_v44, %v2909_v53  ;;  %3061 = vmatprep.mubr.f32.mxu0 %v3344_v0 }
 0x36d   :  { %3316 = vmatpush1.msk.msra.mxu1 %vm3512_vm4, %v2910_v60 }
 0x36e   :  { %3319 = vmatprep.subr.msk.mxu1 %vm3531_vm6, %v3075_v61  ;;  %3317 = vmatmul.mubr.msk.f32.vlgmr.msra.gmra.mxu1 %vm88_vm1, %v3906_v31 }
 0x36f   :  { %v2990_v51 = vpop.permute.xlu1 %2989  ;;  %3144 = vmatprep.mubr.f32.mxu1 %v3344_v0 }
 0x370   :  { %v2993_v62 = vsel %vm691_vm11, %v2990_v51, %v2992_v57 }
 0x371   :  { %3028 = vmatpush1.msra.mxu0 %v2993_v62 }
 0x372   :  { %3318 = vmatmul.mubr.msk.f32.vlgmr.msra.gmra.mxu0 %vm88_vm1, %v3921_v37 }
 0x373   :  { %v3071_v63 = vpop.permute.xlu1 %3070 }
 0x374   :  { %v3074_v59 = vsel %vm778_vm12, %v3071_v63, %v3073_v39 }
 0x375   :  { %3320 = vmatpush1.msk.msra.mxu1 %vm3541_vm7, %v3074_v59 }
 0x376   :  { %3321 = vmatmul.mubr.msk.f32.vlgmr.msra.gmra.mxu1 %vm88_vm1, %v3930_v42 }
 0x3ef   :  { %v1739_v20 = vpop.f32.mrf.mxu0 }
 0x3f1   :  { %v1741_v25 = vpop.f32.mrf.mxu0 }
 0x3f7   :  { %v1813_v1 = vpop.f32.mrf.mxu1 }
 0x3f8   :  { %v1814_v5 = vadd.f32 %v1813_v1, %v1739_v20 }
 0x3f9   :  { %v1815_v2 = vpop.f32.mrf.mxu1 }
 0x3fa   :  { %v1816_v8 = vadd.f32 %v1815_v2, %v1741_v25 }
 0x3ff   :  { %v1899_v0 = vpop.f32.mrf.mxu0 }
 0x400   :  { %v1904_v9 = vadd.f32 %v1899_v0, %v1814_v5 }
 0x401   :  { %v1901_v6 = vpop.f32.mrf.mxu0 }
 0x402   :  { %v1905_v11 = vadd.f32 %v1901_v6, %v1816_v8 }
 0x403   :  { %v2065_v10 = vpop.f32.mrf.mxu0 }
 0x405   :  { %v2067_v16 = vpop.f32.mrf.mxu0 }
 0x407   :  { %v1987_v12 = vpop.f32.mrf.mxu1 }
 0x408   :  { %v1992_v13 = vadd.f32 %v1987_v12, %v1904_v9 }
 0x409   :  { %v1989_v14 = vpop.f32.mrf.mxu1 }
 0x40a   :  { %v1993_v29 = vadd.f32 %v1989_v14, %v1905_v11  ;;  %v2070_v21 = vadd.f32 %v2065_v10, %v1992_v13 }
 0x40b   :  { %v2153_v22 = vpop.f32.mrf.mxu1 }
 0x40c   :  { %v2071_v23 = vadd.f32 %v2067_v16, %v1993_v29  ;;  %v2158_v3 = vadd.f32 %v2153_v22, %v2070_v21 }
 0x40d   :  { %v2155_v4 = vpop.f32.mrf.mxu1 }
 0x40e   :  { %v2159_v24 = vadd.f32 %v2155_v4, %v2071_v23  ;;  %v2241_v26 = vpop.f32.mrf.mxu0 }
 0x40f   :  { %v2246_v27 = vadd.f32 %v2241_v26, %v2158_v3 }
 0x410   :  { %v2243_v28 = vpop.f32.mrf.mxu0 }
 0x411   :  { %v2247_v31 = vadd.f32 %v2243_v28, %v2159_v24  ;;  %v1645_v28 = vld [vmem:[%s4061_s5] sm:$0xff] }
 0x412   :  { %v2327_v32 = vpop.f32.mrf.mxu1 }
 0x413   :  { %v2332_v34 = vadd.f32 %v2327_v32, %v2246_v27 }
 0x414   :  { %v2329_v35 = vpop.f32.mrf.mxu1 }
 0x415   :  { %v2333_v36 = vadd.f32 %v2329_v35, %v2247_v31 }
 0x416   :  { %v2415_v37 = vpop.f32.mrf.mxu0 }
 0x417   :  { %v4014_v38 = vadd.f32 %v2415_v37, %v2332_v34  ;;  %v1646_v34 = vld [vmem:[%s4062_s6] sm:$0xff] }
 0x418   :  { %v2417_v40 = vpop.f32.mrf.mxu0 }
 0x419   :  { %v4016_v41 = vadd.f32 %v2417_v40, %v2333_v36  ;;  %v3156_v42 = vmul.f32 %v4014_v38, %v4014_v38 }
 0x41b   :  { %v2508_v43 = vpop.f32.mrf.mxu1  ;;  %v3153_v15 = vadd.f32 %v4016_v41, %v4014_v38  ;;  %v3157_v19 = vmul.f32 %v4016_v41, %v4016_v41 }
 0x41d   :  { %3154 = vadd.xlane.f32.xlu0 %v3153_v15  ;;  %v3158_v45 = vadd.f32 %v3157_v19, %v3156_v42  ;;  %v2510_v46 = vpop.f32.mrf.mxu1 }
 0x41f   :  { %v2579_v49 = vpop.f32.mrf.mxu0 }
 0x420   :  { %v2580_v50 = vadd.f32 %v2579_v49, %v2508_v43 }
 0x421   :  { %v2581_v52 = vpop.f32.mrf.mxu0  ;;  %3159 = vadd.xlane.f32.xlu0 %v3158_v45 }
 0x422   :  { %v2582_v53 = vadd.f32 %v2581_v52, %v2510_v46 }
 0x423   :  { %v2660_v7 = vpop.f32.mrf.mxu1 }
 0x424   :  { %v2665_v54 = vadd.f32 %v2660_v7, %v2580_v50 }
 0x425   :  { %v2662_v55 = vpop.f32.mrf.mxu1 }
 0x426   :  { %v2666_v17 = vadd.f32 %v2662_v55, %v2582_v53  ;;  %v3340_v55 = vld [vmem:[%s4056_s0] sm:$0xff] }
 0x427   :  { %v2743_v56 = vpop.f32.mrf.mxu0 }
 0x428   :  { %v2748_v57 = vadd.f32 %v2743_v56, %v2665_v54  ;;  %v2816_v58 = vpop.f32.mrf.mxu1  ;;  %v3342_v56 = vld [vmem:[%s4056_s0 + $0x10] sm:$0xff] }
 0x429   :  { %v2745_v30 = vpop.f32.mrf.mxu0 }
 0x42a   :  { %v2749_v48 = vadd.f32 %v2745_v30, %v2666_v17  ;;  %v2821_v47 = vadd.f32 %v2816_v58, %v2748_v57  ;;  %v2818_v33 = vpop.f32.mrf.mxu1  ;;  %v3343_v58 = vld [vmem:[%s4056_s0 + $0x18] sm:$0xff] }
 0x42b   :  { %v2899_v18 = vpop.f32.mrf.mxu0 }
 0x42c   :  { %v2822_v39 = vadd.f32 %v2818_v33, %v2749_v48  ;;  %v2904_v44 = vadd.f32 %v2899_v18, %v2821_v47 }
 0x42d   :  { %v2901_v60 = vpop.f32.mrf.mxu0 }
 0x42e   :  { %v2982_v61 = vpop.f32.mrf.mxu1  ;;  %v2905_v51 = vadd.f32 %v2901_v60, %v2822_v39 }
 0x42f   :  { %v2987_v62 = vadd.f32 %v2982_v61, %v2904_v44 }
 0x430   :  { %v2984_v63 = vpop.f32.mrf.mxu1 }
 0x431   :  { %v2988_v25 = vadd.f32 %v2984_v63, %v2905_v51 }
 0x432   :  { %v3063_v59 = vpop.f32.mrf.mxu0 }
 0x433   :  { %v3068_v1 = vadd.f32 %v3063_v59, %v2987_v62 }
 0x434   :  { %v3065_v20 = vpop.f32.mrf.mxu0 }
 0x435   :  { %v3069_v0 = vadd.f32 %v3065_v20, %v2988_v25 }
 0x436   :  { %v3146_v2 = vpop.f32.mrf.mxu1 }
 0x437   :  { %v3151_v5 = vadd.f32 %v3146_v2, %v3068_v1 }
 0x438   :  { %v3148_v6 = vpop.f32.mrf.mxu1 }
 0x439   :  { %v3152_v8 = vadd.f32 %v3148_v6, %v3069_v0  ;;  %v3165_v10 = vmul.f32 %v3151_v5, %v3151_v5 }
 0x43b   :  { %v3161_v9 = vadd.f32 %v3152_v8, %v3151_v5  ;;  %v3166_v11 = vmul.f32 %v3152_v8, %v3152_v8 }
 0x43d   :  { %3162 = vadd.xlane.f32.xlu1 %v3161_v9  ;;  %v3167_v12 = vadd.f32 %v3166_v11, %v3165_v10 }
 0x43f   :  { %3168 = vadd.xlane.f32.xlu0 %v3167_v12 }
 0x4a6   :  { %v3155_v13 = vpop.xlane.xlu0 %3154 }
 0x4aa   :  { %v3160_v14 = vpop.xlane.xlu0 %3159 }
 0x4c6   :  { %v3163_v16 = vpop.xlane.xlu1 %3162 }
 0x4c7   :  { %v3164_v29 = vadd.f32 %v3163_v16, %v3155_v13 }
 0x4c8   :  { %v3169_v21 = vpop.xlane.xlu0 %3168 }
 0x4c9   :  { %v3171_v22 = vmul.f32 0.001953125, %v3164_v29  ;;  %v3170_v23 = vadd.f32 %v3169_v21, %v3160_v14 }
 0x4cb   :  { %v3173_v3 = vmul.f32 %v3171_v22, %v3171_v22  ;;  %v3172_v4 = vmul.f32 0.001953125, %v3170_v23 }
 0x4cd   :  { %v3174_v24 = vsub.f32 %v3172_v4, %v3173_v3 }
 0x4cf   :  { %v3175_v26 = vmax.f32 %v3174_v24, 0.0 }
 0x4d1   :  { %v3176_v27 = vadd.f32 1e-05, %v3175_v26 }
 0x4d3   :  { %3338 = vrsqrt.f32 %v3176_v27 }
 0x4e0   :  { %v3339_v31 = vpop.eup %3338 }
 0x4e1   :  { %v3178_v32 = vmul.f32 %v3339_v31, %v1645_v28 }
 0x4e3   :  { %3183 = vperm.xlu1 %3334, %v3178_v32   ;;  %v3179_v35 = vmul.f32 %v3178_v32, %v3171_v22 }
 0x4e5   :  { %v3180_v36 = vsub.f32 %v1646_v34, %v3179_v35 }
 0x4e7   :  { %3190 = vperm.xlu0 %3335, %v3180_v36  }
 0x55e   :  { %v3184_v37 = vpop.permute.xlu1 %3183 }
 0x55f   :  { %v3186_v40 = vmul.f32 %v3184_v37, %v4014_v38  ;;  %v3187_v42 = vmul.f32 %v3184_v37, %v4016_v41  ;;  %v3197_v43 = vmul.f32 %v3184_v37, %v3151_v5  ;;  %v3198_v15 = vmul.f32 %v3184_v37, %v3152_v8  ;;  %v3341_v38 = vld [vmem:[%s4056_s0 + $0x8] sm:$0xff] }
 0x562   :  { %v3191_v19 = vpop.permute.xlu0 %3190 }
 0x563   :  { %v3193_v45 = vadd.f32 %v3191_v19, %v3186_v40  ;;  %v3194_v46 = vadd.f32 %v3191_v19, %v3187_v42  ;;  %v3199_v49 = vadd.f32 %v3197_v43, %v3191_v19  ;;  %v3200_v50 = vadd.f32 %v3198_v15, %v3191_v19 }
 0x565   :  { %v3195_v52 = vmax.f32 %v3193_v45, 0.0  ;;  %v3196_v53 = vmax.f32 %v3194_v46, 0.0  ;;  %v3201_v7 = vmax.f32 %v3199_v49, 0.0  ;;  %v3202_v54 = vmax.f32 %v3200_v50, 0.0 }
 0x567   :  { %v3203_v17 = vadd.f32 %v3340_v55, %v3195_v52  ;;  %v3204_v41 = vadd.f32 %v3341_v38, %v3196_v53  ;;  %v3209_v57 = vadd.f32 %v3342_v56, %v3201_v7  ;;  %v3210_v30 = vadd.f32 %v3343_v58, %v3202_v54 }
 0x569   :  { %v3205_v48 = vmax.f32 %v3203_v17, 0.0  ;;  %v3206_v47 = vmax.f32 %v3204_v41, 0.0  ;;  %v3211_v33 = vmax.f32 %v3209_v57, 0.0  ;;  %v3212_v18 = vmax.f32 %v3210_v30, 0.0 }
 0x56b   :  { %3207 = vst [vmem:[%s4063_s7] sm:$0xff] %v3205_v48  ;;  %3208 = vst [vmem:[%s4063_s7 + $0x8] sm:$0xff] %v3206_v47 }
 0x56c   :  { %3322 = vst [vmem:[%s4063_s7 + $0x10] sm:$0xff] %v3211_v33  ;;  %3323 = vst [vmem:[%s4063_s7 + $0x18] sm:$0xff] %v3212_v18 }

</bundles_post_ra>
